<compile_context>
chip_gen: v6e
topology: v6e:2x2x1
jax: 0.10.0
libtpu: 0.0.40
codegen_flags: <defaults>
</compile_context>

<pallas_src>
import functools

import jax
import jax.numpy as jnp
from jax.experimental import pallas as pl
from jax.experimental.pallas import tpu as pltpu

LANE = 128      # vreg lane width
SUBLANE = 8     # vreg sublane count


def _round_up(n, m):
    return ((n + m - 1) // m) * m


def _pad_to(x, shape):
    pads = [(0, t - s) for s, t in zip(x.shape, shape)]
    if all(p == (0, 0) for p in pads):
        return x
    return jnp.pad(x, pads)


# ---------------------------------------------------------------------------
# Kernel
# ---------------------------------------------------------------------------
def bob_kernel(x_ref, w_in_ref, b_in_ref, w_mlp_ref, b_mlp_ref,
               w_out_ref, b_out_ref, o_ref, *, depth):
    dt = w_in_ref.dtype   # MXU operand dtype (f32 default, bf16 for scaled cfgs)

    # Input layer: single matmul over the pre-concatenated (c | k) tile.
    h = jnp.dot(x_ref[...].astype(dt), w_in_ref[...],
                preferred_element_type=jnp.float32)
    h = jnp.maximum(h + b_in_ref[...], 0.0)

    # Residual MLP stack: h = relu(h + layer(h)).  depth is small here, so a
    # static unroll keeps everything on the MXU critical path.
    # TODO(synk): for scaled depth/hidden, stream one (H, H) layer per grid
    # step (innermost "arbitrary" depth axis or pltpu.emit_pipeline) with
    # pl.Buffered(1) on the truly-resident specs instead of keeping the whole
    # (d, H, H) stack in VMEM (v7x has only 64 MiB/TC).
    for i in range(depth - 1):
        y = jnp.dot(h.astype(dt), w_mlp_ref[i],
                    preferred_element_type=jnp.float32) + b_mlp_ref[i]
        h = jnp.maximum(h + y, 0.0)

    # Output layer + tanh (EUP), lane-dense store.
    out = jnp.dot(h.astype(dt), w_out_ref[...],
                  preferred_element_type=jnp.float32) + b_out_ref[...]
    o_ref[...] = jnp.tanh(out).astype(o_ref.dtype)


# ---------------------------------------------------------------------------
# One-time parameter preparation (hoisted out of the per-call hot path)
# ---------------------------------------------------------------------------
def prepare_bob_params(params, *, depth, mxu_dtype=jnp.float32, lane=LANE):
    """Pad/cast parameters once.  Zero padding is inert for this network.

    For scaled v6e/v7x configs: pass mxu_dtype=jnp.bfloat16 (weights + the
    in-kernel activation casts go through bf16, accumulation stays f32) and
    consider lane=256 to fill the 2x256^2 MXUs; keep lane=128 for v5e.
    """
    w_in, b_in, w_mlp, b_mlp, w_out, b_out = params
    in_dim, hidden = w_in.shape
    plain = w_out.shape[1]
    H = _round_up(hidden, lane)
    P = _round_up(plain, lane)

    w_in_p = _pad_to(w_in, (in_dim, H)).astype(mxu_dtype)
    b_in_p = _pad_to(b_in.reshape(1, -1), (1, H)).astype(jnp.float32)

    d = depth - 1
    if d > 0:
        w_mlp_p = _pad_to(w_mlp, (d, H, H)).astype(mxu_dtype)
        b_mlp_p = _pad_to(b_mlp.reshape(d, 1, -1), (d, 1, H)).astype(jnp.float32)
    else:  # keep operand shapes non-empty; the kernel loop body never runs.
        w_mlp_p = jnp.zeros((1, H, H), mxu_dtype)
        b_mlp_p = jnp.zeros((1, 1, H), jnp.float32)

    w_out_p = _pad_to(w_out, (H, P)).astype(mxu_dtype)
    b_out_p = _pad_to(b_out.reshape(1, -1), (1, P)).astype(jnp.float32)

    return (w_in_p, b_in_p, w_mlp_p, b_mlp_p, w_out_p, b_out_p)


def _pick_block_rows(batch, *, max_rows=1024, target_blocks=2):
    """Adaptive batch tile: few large blocks (>= target_blocks so both v7x TCs
    get work), capped so double-buffered activation tiles stay small in VMEM.
    On 1-TC chips (v5e/v6e) fewer, larger steps minimize the ~0.35us/step tax."""
    pb = _round_up(batch, SUBLANE)
    bb = _round_up((pb + target_blocks - 1) // target_blocks, SUBLANE)
    return max(SUBLANE, min(bb, max_rows))


# ---------------------------------------------------------------------------
# Forward wrapper (activations only; params arrive pre-padded)
# ---------------------------------------------------------------------------
@functools.partial(jax.jit, static_argnames=("depth", "plain", "block_rows"))
def bob_forward(c, k, padded_params, *, depth, plain, block_rows=None):
    w_in_p, b_in_p, w_mlp_p, b_mlp_p, w_out_p, b_out_p = padded_params
    batch = c.shape[0]
    in_dim = w_in_p.shape[0]
    H = w_in_p.shape[1]
    P = w_out_p.shape[1]

    # Pre-concatenate (c | k) once in the wrapper: a single HBM->VMEM input
    # stream and one MXU push for the first layer.
    x = jnp.concatenate([c, k], axis=-1).astype(jnp.float32)

    bb = block_rows if block_rows is not None else _pick_block_rows(batch)
    bb = _round_up(min(bb, _round_up(batch, SUBLANE)), SUBLANE)
    pad_batch = _round_up(batch, bb)
    grid_b = pad_batch // bb
    if pad_batch != batch:   # skip the extra HBM pad copy when already aligned
        x = _pad_to(x, (pad_batch, in_dim))

    # Weights/biases: same block on every grid step -> stay resident in VMEM.
    def resident(arr):
        return pl.BlockSpec(arr.shape, lambda i, _n=arr.ndim: (0,) * _n)

    # Explicit VMEM budget: resident params + double-buffered activation tiles
    # + in-flight hidden working set.  Floor 32 MiB (v5e scoped default is
    # 16 MiB), cap 48 MiB (headroom below v7x's 64 MiB/TC for Mosaic scratch).
    param_bytes = sum(int(a.size) * a.dtype.itemsize for a in padded_params)
    act_bytes = 2 * bb * (in_dim + P) * 4 + 4 * bb * H * 4
    vmem_limit = int(min(max(2 * (param_bytes + act_bytes), 32 << 20), 48 << 20))

    out = pl.pallas_call(
        functools.partial(bob_kernel, depth=depth),
        out_shape=jax.ShapeDtypeStruct((pad_batch, P), jnp.float32),
        grid=(grid_b,),
        in_specs=[
            pl.BlockSpec((bb, in_dim), lambda i: (i, 0)),   # (c | k) activations
            resident(w_in_p), resident(b_in_p),
            resident(w_mlp_p), resident(b_mlp_p),
            resident(w_out_p), resident(b_out_p),
        ],
        out_specs=pl.BlockSpec((bb, P), lambda i: (i, 0)),
        compiler_params=pltpu.CompilerParams(
            # shards batch blocks across v7x's two TCs; neutral on 1-TC chips
            dimension_semantics=("parallel",),
            vmem_limit_bytes=vmem_limit,
        ),
    )(x, w_in_p, b_in_p, w_mlp_p, b_mlp_p, w_out_p, b_out_p)

    if pad_batch != batch or P != plain:
        out = out[:batch, :plain]
    return out


# ---------------------------------------------------------------------------
# Pure-JAX reference + init
# ---------------------------------------------------------------------------
def bob_reference(c, k, params, *, depth):
    """Pure-JAX reference mirroring the PyTorch forward."""
    w_in, b_in, w_mlp, b_mlp, w_out, b_out = params
    x = jnp.concatenate([c, k], axis=-1)
    h = jax.nn.relu(x @ w_in + b_in[0])
    for i in range(depth - 1):
        h = jax.nn.relu(h + (h @ w_mlp[i] + b_mlp[i, 0]))
    return jnp.tanh(h @ w_out + b_out[0])


def init_params(key, *, cipher, key_bits, hidden, depth, plain):
    """Deterministic parameter init (shapes follow the nn.Module __init__)."""
    ks = jax.random.split(key, 6)
    in_dim = cipher + key_bits
    scale = 0.1
    w_in = scale * jax.random.normal(ks[0], (in_dim, hidden), jnp.float32)
    b_in = scale * jax.random.normal(ks[1], (1, hidden), jnp.float32)
    w_mlp = scale * jax.random.normal(ks[2], (max(depth - 1, 0), hidden, hidden), jnp.float32)
    b_mlp = scale * jax.random.normal(ks[3], (max(depth - 1, 0), 1, hidden), jnp.float32)
    w_out = scale * jax.random.normal(ks[4], (hidden, plain), jnp.float32)
    b_out = scale * jax.random.normal(ks[5], (1, plain), jnp.float32)
    return (w_in, b_in, w_mlp, b_mlp, w_out, b_out)


if __name__ == "__main__":
    # Config consistent with the module: (cipher + key) -> hidden -> ... -> plain.
    # batch is large enough to exercise the batch grid (2 blocks with the
    # adaptive tiling), matching the module's small-model regime.
    config = dict(cipher=16, key=16, plain=16, hidden=32, depth=3, batch=512)

    root = jax.random.PRNGKey(0)
    k_params, k_c, k_k = jax.random.split(root, 3)

    params = init_params(
        k_params,
        cipher=config["cipher"], key_bits=config["key"],
        hidden=config["hidden"], depth=config["depth"], plain=config["plain"],
    )

    c = jax.random.normal(k_c, (config["batch"], config["cipher"]), jnp.float32)
    k = jax.random.normal(k_k, (config["batch"], config["key"]), jnp.float32)

    # One-time parameter prep, hoisted out of the per-call hot path.
    # (For scaled v6e/v7x configs: mxu_dtype=jnp.bfloat16 + relaxed tolerance.)
    padded_params = jax.tree_util.tree_map(
        jax.block_until_ready,
        prepare_bob_params(params, depth=config["depth"]))

    out = bob_forward(c, k, padded_params,
                      depth=config["depth"], plain=config["plain"])
    out = jax.block_until_ready(out)

    ref = bob_reference(c, k, params, depth=config["depth"])
    assert out.shape == (config["batch"], config["plain"])
    assert jnp.allclose(out, ref, atol=1e-5, rtol=1e-5), "mismatch vs reference"

    print("KERNEL_OK")
</pallas_src>

<mosaic_0001>
module attributes {stable_mosaic.version = 11 : i64} {
  func.func @bob_kernel(%arg0: i32, %arg1: memref<256x32xf32, #tpu.memory_space<vmem>>, %arg2: memref<32x128xf32, #tpu.memory_space<vmem>>, %arg3: memref<1x128xf32, #tpu.memory_space<vmem>>, %arg4: memref<2x128x128xf32, #tpu.memory_space<vmem>>, %arg5: memref<2x1x128xf32, #tpu.memory_space<vmem>>, %arg6: memref<128x128xf32, #tpu.memory_space<vmem>>, %arg7: memref<1x128xf32, #tpu.memory_space<vmem>>, %arg8: memref<256x128xf32, #tpu.memory_space<vmem>>) attributes {dimension_semantics = [#tpu.dimension_semantics<parallel>], iteration_bounds = array<i64: 2>, scalar_prefetch = 0 : i64, scratch_operands = 0 : i64, tpu.core_type = #tpu.core_type<tc>, window_params = [{transform_indices = @transform_0, window_bounds = array<i64: 256, 32>}, {pipeline_mode = #tpu.pipeline_mode<synchronous>, transform_indices = @transform_1, window_bounds = array<i64: 32, 128>}, {pipeline_mode = #tpu.pipeline_mode<synchronous>, transform_indices = @transform_2, window_bounds = array<i64: 1, 128>}, {pipeline_mode = #tpu.pipeline_mode<synchronous>, transform_indices = @transform_3, window_bounds = array<i64: 2, 128, 128>}, {pipeline_mode = #tpu.pipeline_mode<synchronous>, transform_indices = @transform_4, window_bounds = array<i64: 2, 1, 128>}, {pipeline_mode = #tpu.pipeline_mode<synchronous>, transform_indices = @transform_5, window_bounds = array<i64: 128, 128>}, {pipeline_mode = #tpu.pipeline_mode<synchronous>, transform_indices = @transform_6, window_bounds = array<i64: 1, 128>}, {transform_indices = @transform_7, window_bounds = array<i64: 256, 128>}]} {
    %c0 = arith.constant 0 : index
    %c0_0 = arith.constant 0 : index
    %0 = vector.load %arg1[%c0, %c0_0] : memref<256x32xf32, #tpu.memory_space<vmem>>, vector<256x32xf32>
    %c0_1 = arith.constant 0 : index
    %c0_2 = arith.constant 0 : index
    %1 = vector.load %arg2[%c0_1, %c0_2] : memref<32x128xf32, #tpu.memory_space<vmem>>, vector<32x128xf32>
    %cst = arith.constant dense<0.000000e+00> : vector<256x128xf32>
    %2 = tpu.matmul %0, %1, %cst {dimension_numbers = #tpu.dot_dimension_numbers<[1], [0], [0], [1], [0, 0, 1, 1], [], []>} : vector<256x32xf32>, vector<32x128xf32>, vector<256x128xf32> -> vector<256x128xf32>
    %c0_3 = arith.constant 0 : index
    %c0_4 = arith.constant 0 : index
    %3 = vector.load %arg3[%c0_3, %c0_4] : memref<1x128xf32, #tpu.memory_space<vmem>>, vector<1x128xf32>
    %4 = vector.broadcast %3 : vector<1x128xf32> to vector<256x128xf32>
    %5 = arith.addf %2, %4 : vector<256x128xf32>
    %cst_5 = arith.constant 0.000000e+00 : f32
    %6 = vector.broadcast %cst_5 : f32 to vector<256x128xf32>
    %7 = arith.maximumf %5, %6 : vector<256x128xf32>
    %c0_6 = arith.constant 0 : index
    %c0_7 = arith.constant 0 : index
    %c0_8 = arith.constant 0 : index
    %8 = vector.load %arg4[%c0_6, %c0_7, %c0_8] : memref<2x128x128xf32, #tpu.memory_space<vmem>>, vector<1x128x128xf32>
    %9 = vector.shape_cast %8 : vector<1x128x128xf32> to vector<128x128xf32>
    %cst_9 = arith.constant dense<0.000000e+00> : vector<256x128xf32>
    %10 = tpu.matmul %7, %9, %cst_9 {dimension_numbers = #tpu.dot_dimension_numbers<[1], [0], [0], [1], [0, 0, 1, 1], [], []>} : vector<256x128xf32>, vector<128x128xf32>, vector<256x128xf32> -> vector<256x128xf32>
    %c0_10 = arith.constant 0 : index
    %c0_11 = arith.constant 0 : index
    %c0_12 = arith.constant 0 : index
    %11 = vector.load %arg5[%c0_10, %c0_11, %c0_12] : memref<2x1x128xf32, #tpu.memory_space<vmem>>, vector<1x1x128xf32>
    %12 = vector.shape_cast %11 : vector<1x1x128xf32> to vector<1x128xf32>
    %13 = vector.broadcast %12 : vector<1x128xf32> to vector<256x128xf32>
    %14 = arith.addf %10, %13 : vector<256x128xf32>
    %15 = arith.addf %7, %14 : vector<256x128xf32>
    %cst_13 = arith.constant 0.000000e+00 : f32
    %16 = vector.broadcast %cst_13 : f32 to vector<256x128xf32>
    %17 = arith.maximumf %15, %16 : vector<256x128xf32>
    %c1 = arith.constant 1 : index
    %c0_14 = arith.constant 0 : index
    %c0_15 = arith.constant 0 : index
    %18 = vector.load %arg4[%c1, %c0_14, %c0_15] : memref<2x128x128xf32, #tpu.memory_space<vmem>>, vector<1x128x128xf32>
    %19 = vector.shape_cast %18 : vector<1x128x128xf32> to vector<128x128xf32>
    %cst_16 = arith.constant dense<0.000000e+00> : vector<256x128xf32>
    %20 = tpu.matmul %17, %19, %cst_16 {dimension_numbers = #tpu.dot_dimension_numbers<[1], [0], [0], [1], [0, 0, 1, 1], [], []>} : vector<256x128xf32>, vector<128x128xf32>, vector<256x128xf32> -> vector<256x128xf32>
    %c1_17 = arith.constant 1 : index
    %c0_18 = arith.constant 0 : index
    %c0_19 = arith.constant 0 : index
    %21 = vector.load %arg5[%c1_17, %c0_18, %c0_19] : memref<2x1x128xf32, #tpu.memory_space<vmem>>, vector<1x1x128xf32>
    %22 = vector.shape_cast %21 : vector<1x1x128xf32> to vector<1x128xf32>
    %23 = vector.broadcast %22 : vector<1x128xf32> to vector<256x128xf32>
    %24 = arith.addf %20, %23 : vector<256x128xf32>
    %25 = arith.addf %17, %24 : vector<256x128xf32>
    %cst_20 = arith.constant 0.000000e+00 : f32
    %26 = vector.broadcast %cst_20 : f32 to vector<256x128xf32>
    %27 = arith.maximumf %25, %26 : vector<256x128xf32>
    %c0_21 = arith.constant 0 : index
    %c0_22 = arith.constant 0 : index
    %28 = vector.load %arg6[%c0_21, %c0_22] : memref<128x128xf32, #tpu.memory_space<vmem>>, vector<128x128xf32>
    %cst_23 = arith.constant dense<0.000000e+00> : vector<256x128xf32>
    %29 = tpu.matmul %27, %28, %cst_23 {dimension_numbers = #tpu.dot_dimension_numbers<[1], [0], [0], [1], [0, 0, 1, 1], [], []>} : vector<256x128xf32>, vector<128x128xf32>, vector<256x128xf32> -> vector<256x128xf32>
    %c0_24 = arith.constant 0 : index
    %c0_25 = arith.constant 0 : index
    %30 = vector.load %arg7[%c0_24, %c0_25] : memref<1x128xf32, #tpu.memory_space<vmem>>, vector<1x128xf32>
    %31 = vector.broadcast %30 : vector<1x128xf32> to vector<256x128xf32>
    %32 = arith.addf %29, %31 : vector<256x128xf32>
    %33 = math.tanh %32 : vector<256x128xf32>
    %c0_26 = arith.constant 0 : index
    %c0_27 = arith.constant 0 : index
    %34 = vector.load %arg8[%c0_26, %c0_27] : memref<256x128xf32, #tpu.memory_space<vmem>>, vector<256x128xf32>
    tpu.vector_store %arg8[%c0_26, %c0_27], %33 {strides = array<i32>} : memref<256x128xf32, #tpu.memory_space<vmem>>, vector<256x128xf32>,
    return
  }
  func.func @transform_0(%arg0: i32) -> (i32, i32) {
    %c0_i32 = arith.constant 0 : i32
    %c0_i32_0 = arith.constant 0 : i32
    return %arg0, %c0_i32 : i32, i32
  }
  func.func @transform_1(%arg0: i32) -> (i32, i32) {
    %c0_i32 = arith.constant 0 : i32
    %c0_i32_0 = arith.constant 0 : i32
    %c0_i32_1 = arith.constant 0 : i32
    return %c0_i32, %c0_i32_0 : i32, i32
  }
  func.func @transform_2(%arg0: i32) -> (i32, i32) {
    %c0_i32 = arith.constant 0 : i32
    %c0_i32_0 = arith.constant 0 : i32
    %c0_i32_1 = arith.constant 0 : i32
    return %c0_i32, %c0_i32_0 : i32, i32
  }
  func.func @transform_3(%arg0: i32) -> (i32, i32, i32) {
    %c0_i32 = arith.constant 0 : i32
    %c0_i32_0 = arith.constant 0 : i32
    %c0_i32_1 = arith.constant 0 : i32
    %c0_i32_2 = arith.constant 0 : i32
    return %c0_i32, %c0_i32_0, %c0_i32_1 : i32, i32, i32
  }
  func.func @transform_4(%arg0: i32) -> (i32, i32, i32) {
    %c0_i32 = arith.constant 0 : i32
    %c0_i32_0 = arith.constant 0 : i32
    %c0_i32_1 = arith.constant 0 : i32
    %c0_i32_2 = arith.constant 0 : i32
    return %c0_i32, %c0_i32_0, %c0_i32_1 : i32, i32, i32
  }
  func.func @transform_5(%arg0: i32) -> (i32, i32) {
    %c0_i32 = arith.constant 0 : i32
    %c0_i32_0 = arith.constant 0 : i32
    %c0_i32_1 = arith.constant 0 : i32
    return %c0_i32, %c0_i32_0 : i32, i32
  }
  func.func @transform_6(%arg0: i32) -> (i32, i32) {
    %c0_i32 = arith.constant 0 : i32
    %c0_i32_0 = arith.constant 0 : i32
    %c0_i32_1 = arith.constant 0 : i32
    return %c0_i32, %c0_i32_0 : i32, i32
  }
  func.func @transform_7(%arg0: i32) -> (i32, i32) {
    %c0_i32 = arith.constant 0 : i32
    %c0_i32_0 = arith.constant 0 : i32
    return %arg0, %c0_i32 : i32, i32
  }
}

</mosaic_0001>

<bundles_post_ra>
// kernel: bob_forward.1
= control target key start
LH: loop header
LB: loop body
LE: loop exit
PB: predicated region body
PF: predicated region fallthrough
CT: control target
= control target key end

     0   :  { %s2365_s24 = smov 0   ;;  %s3295_s0 = inlined_call_operand.vmem [shape: f32[512,32], index: 0, kind: input, shape index: {}]   ;;  %s3296_s1 = inlined_call_operand.vmem [shape: f32[32,128], index: 1, kind: input, shape index: {}]   ;;  %s3297_s2 = inlined_call_operand.vmem [shape: f32[1,128], index: 2, kind: input, shape index: {}]   ;;  %s3298_s3 = inlined_call_operand.vmem [shape: f32[2,128,128], index: 3, kind: input, shape index: {}]   ;;  %s3299_s4 = inlined_call_operand.vmem [shape: f32[2,1,128], index: 4, kind: input, shape index: {}]   ;;  %s3300_s5 = inlined_call_operand.vmem [shape: f32[128,128], index: 5, kind: input, shape index: {}]   ;;  %s3301_s6 = inlined_call_operand.vmem [shape: f32[1,128], index: 6, kind: input, shape index: {}]   ;;  %s3302_s7 = inlined_call_operand.vmem [shape: f32[512,128], index: 7, kind: output, shape index: {}]  }
   0x1 LB: > { %s1673_s25 = sadd.s32 4294967295, %s2323_s24   ;;  %p1677_p0 = scmp.ge.s32.totalorder %s2323_s24, 1  ;;  %s2323_s24 = sphi %s2365_s24, %s17_s24  }
   0x2   : > { %p238_p1 = scmp.lt.s32.totalorder %s2323_s24, 3 }
   0x4   : > { %p239_p2 = pnand %p1677_p0, %p238_p1 }
   0x5   : > { %s1678_s30 = sshll.u32 (!%p239_p2), %s1673_s25, 5 }
   0x6   : > { %242 = sbr.rel (%p239_p2) target bundleno = 896 (0x380), region = 48  ;;  %p271_p3 = scmp.lt.s32.totalorder (!%p239_p2), %s1678_s30, 63 }
   0xb   : > { %v317_v0 = vld [vmem:[%s3296_s1 + $0x18] sm:$0xff]  ;;  %v316_v1 = vld [vmem:[%s3296_s1 + $0x10] sm:$0xff]  ;;  %v315_v4 = vld [vmem:[%s3296_s1 + $0x8] sm:$0xff]  ;;  %s3378_s30 = smov (!%p271_p3, %s1678_s30), 63  ;;  %vm325_vm0 = vcmask 261120  }
   0xc   : > { %1917 = vmatprep.subr.mxu0 %v317_v0  ;;  %v694_v2 = vld [vmem:[%s3298_s3 + $0x78] sm:$0xff]  ;;  %v693_v3 = vld [vmem:[%s3298_s3 + $0x70] sm:$0xff]  ;;  %v692_v5 = vld [vmem:[%s3298_s3 + $0x68] sm:$0xff]  ;;  %s1679_s18 = sshll.u32 %s3378_s30, 3 }
   0xd   : > { %1918 = vmatpush3.msra.mxu0 %v317_v0  ;;  %1973 = vmatprep.subr.mxu1 %v694_v2  ;;  %v314_v6 = vld [vmem:[%s3296_s1] sm:$0xff]  ;;  %s2402_s21 = scalar_lea.vmem %s3295_s0, %s1679_s18  ;;  %v690_v11 = vld [vmem:[%s3298_s3 + $0x58] sm:$0xff]  ;;  %v689_v13 = vld [vmem:[%s3298_s3 + $0x50] sm:$0xff]  ;;  %s3233_s23 = scalar_lea.vmem %s3302_s7, %s1679_s18 }
   0xe   : > { %1919 = vmatprep.subr.mxu0 %v316_v1  ;;  %1974 = vmatpush3.msra.mxu1 %v694_v2  ;;  %v691_v7 = vld [vmem:[%s3298_s3 + $0x60] sm:$0xff]  ;;  %v283_v9 = vld [vmem:[%s2402_s21 + $0x8] sm:$0xff]  ;;  %v284_v10 = vld [vmem:[%s2402_s21 + $0x10] sm:$0xff] }
   0xf   : > { %1920 = vmatpush3.msra.mxu0 %v316_v1  ;;  %1975 = vmatprep.subr.mxu1 %v693_v3  ;;  %v282_v8 = vld [vmem:[%s2402_s21] sm:$0xff]  ;;  %v285_v12 = vld [vmem:[%s2402_s21 + $0x18] sm:$0xff]  ;;  %v688_v15 = vld [vmem:[%s3298_s3 + $0x48] sm:$0xff] }
  0x10   : > { %1921 = vmatprep.subr.mxu0 %v315_v4  ;;  %1976 = vmatpush3.msra.mxu1 %v693_v3  ;;  %v286_v14 = vld [vmem:[%s2402_s21 + $0x20] sm:$0xff]  ;;  %v287_v16 = vld [vmem:[%s2402_s21 + $0x28] sm:$0xff]  ;;  %v288_v18 = vld [vmem:[%s2402_s21 + $0x30] sm:$0xff] }
  0x11   : > { %1922 = vmatpush3.msra.mxu0 %v315_v4  ;;  %1977 = vmatprep.subr.mxu1 %v692_v5  ;;  %v687_v17 = vld [vmem:[%s3298_s3 + $0x40] sm:$0xff]  ;;  %v686_v19 = vld [vmem:[%s3298_s3 + $0x38] sm:$0xff]  ;;  %v685_v21 = vld [vmem:[%s3298_s3 + $0x30] sm:$0xff] }
  0x12   : > { %1923 = vmatprep.subr.mxu0 %v314_v6  ;;  %1978 = vmatpush3.msra.mxu1 %v692_v5  ;;  %v289_v20 = vld [vmem:[%s2402_s21 + $0x38] sm:$0xff]  ;;  %v290_v22 = vld [vmem:[%s2402_s21 + $0x40] sm:$0xff]  ;;  %v684_v23 = vld [vmem:[%s3298_s3 + $0x28] sm:$0xff] }
  0x13   : > { %1924 = vmatpush3.msra.mxu0 %v314_v6  ;;  %1925 = vmatprep.mubr.msk.f32.mxu0 %vm325_vm0, %v282_v8  ;;  %v291_v24 = vld [vmem:[%s2402_s21 + $0x48] sm:$0xff]  ;;  %v683_v25 = vld [vmem:[%s3298_s3 + $0x20] sm:$0xff]  ;;  %v292_v26 = vld [vmem:[%s2402_s21 + $0x50] sm:$0xff] }
  0x14   : > { %1926 = vmatmul.mubr.msk.f32.vlgmr.msra.gmra.mxu0 %vm325_vm0, %v283_v9  ;;  %1979 = vmatprep.subr.mxu1 %v691_v7  ;;  %v293_v27 = vld [vmem:[%s2402_s21 + $0x58] sm:$0xff]  ;;  %v294_v28 = vld [vmem:[%s2402_s21 + $0x60] sm:$0xff]  ;;  %v295_v29 = vld [vmem:[%s2402_s21 + $0x68] sm:$0xff] }
  0x15   : > { %1928 = vmatprep.mubr.msk.f32.mxu0 %vm325_vm0, %v284_v10  ;;  %1980 = vmatpush3.msra.mxu1 %v691_v7  ;;  %v296_v30 = vld [vmem:[%s2402_s21 + $0x70] sm:$0xff]  ;;  %v297_v31 = vld [vmem:[%s2402_s21 + $0x78] sm:$0xff]  ;;  %v298_v32 = vld [vmem:[%s2402_s21 + $0x80] sm:$0xff] }
  0x16   : > { %1981 = vmatprep.subr.mxu1 %v690_v11  ;;  %v299_v33 = vld [vmem:[%s2402_s21 + $0x88] sm:$0xff]  ;;  %v300_v34 = vld [vmem:[%s2402_s21 + $0x90] sm:$0xff]  ;;  %v301_v35 = vld [vmem:[%s2402_s21 + $0x98] sm:$0xff] }
  0x17   : > { %1982 = vmatpush3.msra.mxu1 %v690_v11  ;;  %v302_v36 = vld [vmem:[%s2402_s21 + $0xa0] sm:$0xff]  ;;  %v303_v37 = vld [vmem:[%s2402_s21 + $0xa8] sm:$0xff]  ;;  %v304_v38 = vld [vmem:[%s2402_s21 + $0xb0] sm:$0xff] }
  0x18   : > { %1929 = vmatmul.mubr.msk.f32.gmra.mxu0 %vm325_vm0, %v285_v12  ;;  %1983 = vmatprep.subr.mxu1 %v689_v13  ;;  %v305_v39 = vld [vmem:[%s2402_s21 + $0xb8] sm:$0xff]  ;;  %v306_v40 = vld [vmem:[%s2402_s21 + $0xc0] sm:$0xff]  ;;  %v307_v41 = vld [vmem:[%s2402_s21 + $0xc8] sm:$0xff] }
  0x19   : > { %1931 = vmatprep.mubr.msk.f32.mxu0 %vm325_vm0, %v286_v14  ;;  %1984 = vmatpush3.msra.mxu1 %v689_v13  ;;  %v308_v42 = vld [vmem:[%s2402_s21 + $0xd0] sm:$0xff]  ;;  %v309_v43 = vld [vmem:[%s2402_s21 + $0xd8] sm:$0xff]  ;;  %v310_v44 = vld [vmem:[%s2402_s21 + $0xe0] sm:$0xff] }
  0x1a   : > { %1985 = vmatprep.subr.mxu1 %v688_v15  ;;  %v311_v45 = vld [vmem:[%s2402_s21 + $0xe8] sm:$0xff]  ;;  %v312_v46 = vld [vmem:[%s2402_s21 + $0xf0] sm:$0xff]  ;;  %v313_v47 = vld [vmem:[%s2402_s21 + $0xf8] sm:$0xff] }
  0x1b   : > { %1986 = vmatpush3.msra.mxu1 %v688_v15  ;;  %v682_v48 = vld [vmem:[%s3298_s3 + $0x18] sm:$0xff]  ;;  %v681_v49 = vld [vmem:[%s3298_s3 + $0x10] sm:$0xff]  ;;  %v680_v50 = vld [vmem:[%s3298_s3 + $0x8] sm:$0xff] }
  0x1c   : > { %1932 = vmatmul.mubr.msk.f32.gmra.mxu0 %vm325_vm0, %v287_v16  ;;  %1987 = vmatprep.subr.mxu1 %v687_v17  ;;  %v679_v51 = vld [vmem:[%s3298_s3] sm:$0xff]  ;;  %v1731_v52 = vld [vmem:[%s3298_s3 + $0xf8] sm:$0xff]  ;;  %v1730_v53 = vld [vmem:[%s3298_s3 + $0xf0] sm:$0xff] }
  0x1d   : > { %1934 = vmatprep.mubr.msk.f32.mxu0 %vm325_vm0, %v288_v18  ;;  %1988 = vmatpush3.msra.mxu1 %v687_v17  ;;  %v1729_v54 = vld [vmem:[%s3298_s3 + $0xe8] sm:$0xff]  ;;  %v1728_v55 = vld [vmem:[%s3298_s3 + $0xe0] sm:$0xff]  ;;  %v1727_v56 = vld [vmem:[%s3298_s3 + $0xd8] sm:$0xff] }
  0x1e   : > { %1989 = vmatprep.subr.mxu1 %v686_v19  ;;  %2053 = vmatprep.subr.mxu0 %v1731_v52  ;;  %v1726_v57 = vld [vmem:[%s3298_s3 + $0xd0] sm:$0xff]  ;;  %v1725_v58 = vld [vmem:[%s3298_s3 + $0xc8] sm:$0xff]  ;;  %v1724_v59 = vld [vmem:[%s3298_s3 + $0xc0] sm:$0xff] }
  0x1f   : > { %1990 = vmatpush3.msra.mxu1 %v686_v19  ;;  %2054 = vmatpush3.msra.mxu0 %v1731_v52  ;;  %v1723_v60 = vld [vmem:[%s3298_s3 + $0xb8] sm:$0xff]  ;;  %v1722_v61 = vld [vmem:[%s3298_s3 + $0xb0] sm:$0xff]  ;;  %v1721_v62 = vld [vmem:[%s3298_s3 + $0xa8] sm:$0xff] }
  0x20   : > { %1935 = vmatmul.mubr.msk.f32.gmra.mxu0 %vm325_vm0, %v289_v20  ;;  %1991 = vmatprep.subr.mxu1 %v685_v21  ;;  %v1720_v63 = vld [vmem:[%s3298_s3 + $0xa0] sm:$0xff]  ;;  %v1719_v0 = vld [vmem:[%s3298_s3 + $0x98] sm:$0xff]  ;;  %v1718_v1 = vld [vmem:[%s3298_s3 + $0x90] sm:$0xff] }
  0x21   : > { %1937 = vmatprep.mubr.msk.f32.mxu0 %vm325_vm0, %v290_v22  ;;  %1992 = vmatpush3.msra.mxu1 %v685_v21  ;;  %v2552_v2 = vld [vmem:[%s3297_s2] ss:$0 sm:$0xff] }
  0x22   : > { %1993 = vmatprep.subr.mxu1 %v684_v23  ;;  %2055 = vmatprep.subr.mxu0 %v1730_v53 }
  0x23   : > { %1994 = vmatpush3.msra.mxu1 %v684_v23  ;;  %2056 = vmatpush3.msra.mxu0 %v1730_v53 }
  0x24   : > { %1938 = vmatmul.mubr.msk.f32.gmra.mxu0 %vm325_vm0, %v291_v24  ;;  %1995 = vmatprep.subr.mxu1 %v683_v25 }
  0x25   : > { %1940 = vmatprep.mubr.msk.f32.mxu0 %vm325_vm0, %v292_v26  ;;  %1996 = vmatpush3.msra.mxu1 %v683_v25 }
  0x26   : > { %1997 = vmatprep.subr.mxu1 %v682_v48  ;;  %2057 = vmatprep.subr.mxu0 %v1729_v54 }
  0x27   : > { %1998 = vmatpush3.msra.mxu1 %v682_v48  ;;  %2058 = vmatpush3.msra.mxu0 %v1729_v54 }
  0x28   : > { %1941 = vmatmul.mubr.msk.f32.gmra.mxu0 %vm325_vm0, %v293_v27  ;;  %1999 = vmatprep.subr.mxu1 %v681_v49 }
  0x29   : > { %1943 = vmatprep.mubr.msk.f32.mxu0 %vm325_vm0, %v294_v28  ;;  %2000 = vmatpush3.msra.mxu1 %v681_v49 }
  0x2a   : > { %2001 = vmatprep.subr.mxu1 %v680_v50  ;;  %2059 = vmatprep.subr.mxu0 %v1728_v55 }
  0x2b   : > { %2002 = vmatpush3.msra.mxu1 %v680_v50  ;;  %2060 = vmatpush3.msra.mxu0 %v1728_v55 }
  0x2c   : > { %1944 = vmatmul.mubr.msk.f32.gmra.mxu0 %vm325_vm0, %v295_v29  ;;  %2003 = vmatprep.subr.mxu1 %v679_v51 }
  0x2d   : > { %1946 = vmatprep.mubr.msk.f32.mxu0 %vm325_vm0, %v296_v30  ;;  %2004 = vmatpush3.msra.mxu1 %v679_v51 }
  0x2e   : > { %2061 = vmatprep.subr.mxu0 %v1727_v56 }
  0x2f   : > { %2062 = vmatpush3.msra.mxu0 %v1727_v56 }
  0x30   : > { %1947 = vmatmul.mubr.msk.f32.gmra.mxu0 %vm325_vm0, %v297_v31  ;;  %2063 = vmatprep.subr.mxu0 %v1726_v57 }
  0x31   : > { %1949 = vmatprep.mubr.msk.f32.mxu0 %vm325_vm0, %v298_v32  ;;  %2064 = vmatpush3.msra.mxu0 %v1726_v57 }
  0x32   : > { %2065 = vmatprep.subr.mxu0 %v1725_v58 }
  0x33   : > { %2066 = vmatpush3.msra.mxu0 %v1725_v58 }
  0x34   : > { %1950 = vmatmul.mubr.msk.f32.gmra.mxu0 %vm325_vm0, %v299_v33  ;;  %2067 = vmatprep.subr.mxu0 %v1724_v59 }
  0x35   : > { %1952 = vmatprep.mubr.msk.f32.mxu0 %vm325_vm0, %v300_v34  ;;  %2068 = vmatpush3.msra.mxu0 %v1724_v59 }
  0x36   : > { %2069 = vmatprep.subr.mxu0 %v1723_v60 }
  0x37   : > { %2070 = vmatpush3.msra.mxu0 %v1723_v60 }
  0x38   : > { %1953 = vmatmul.mubr.msk.f32.gmra.mxu0 %vm325_vm0, %v301_v35  ;;  %2071 = vmatprep.subr.mxu0 %v1722_v61 }
  0x39   : > { %1955 = vmatprep.mubr.msk.f32.mxu0 %vm325_vm0, %v302_v36  ;;  %2072 = vmatpush3.msra.mxu0 %v1722_v61 }
  0x3a   : > { %2073 = vmatprep.subr.mxu0 %v1721_v62 }
  0x3b   : > { %2074 = vmatpush3.msra.mxu0 %v1721_v62 }
  0x3c   : > { %1956 = vmatmul.mubr.msk.f32.gmra.mxu0 %vm325_vm0, %v303_v37  ;;  %2075 = vmatprep.subr.mxu0 %v1720_v63 }
  0x3d   : > { %1958 = vmatprep.mubr.msk.f32.mxu0 %vm325_vm0, %v304_v38  ;;  %2076 = vmatpush3.msra.mxu0 %v1720_v63 }
  0x3e   : > { %2077 = vmatprep.subr.mxu0 %v1719_v0 }
  0x3f   : > { %2078 = vmatpush3.msra.mxu0 %v1719_v0 }
  0x40   : > { %1959 = vmatmul.mubr.msk.f32.gmra.mxu0 %vm325_vm0, %v305_v39  ;;  %2079 = vmatprep.subr.mxu0 %v1718_v1 }
  0x41   : > { %1961 = vmatprep.mubr.msk.f32.mxu0 %vm325_vm0, %v306_v40  ;;  %2080 = vmatpush3.msra.mxu0 %v1718_v1 }
  0x44   : > { %1962 = vmatmul.mubr.msk.f32.gmra.mxu0 %vm325_vm0, %v307_v41 }
  0x45   : > { %1964 = vmatprep.mubr.msk.f32.mxu0 %vm325_vm0, %v308_v42 }
  0x48   : > { %1965 = vmatmul.mubr.msk.f32.gmra.mxu0 %vm325_vm0, %v309_v43 }
  0x49   : > { %1967 = vmatprep.mubr.msk.f32.mxu0 %vm325_vm0, %v310_v44 }
  0x4c   : > { %1968 = vmatmul.mubr.msk.f32.gmra.mxu0 %vm325_vm0, %v311_v45 }
  0x4d   : > { %1970 = vmatprep.mubr.msk.f32.mxu0 %vm325_vm0, %v312_v46 }
  0x50   : > { %1971 = vmatmul.mubr.msk.f32.gmra.mxu0 %vm325_vm0, %v313_v47 }
  0xd4   : > { %v1927_v3 = vpop.f32.mrf.mxu0 }
  0xd5   : > { %v2555_v4 = vadd.f32 %v1927_v3, %v2552_v2 }
  0xd6   : > { %v488_v5 = vpop.f32.mrf.mxu0 }
  0xd7   : > { %v2558_v6 = vadd.f32 %v2552_v2, %v488_v5  ;;  %v648_v9 = vmax.f32 %v2555_v4, 0.0 }
  0xd8   : > { %v1930_v7 = vpop.f32.mrf.mxu0 }
  0xd9   : > { %v647_v8 = vmax.f32 %v2558_v6, 0.0  ;;  %v2563_v10 = vadd.f32 %v1930_v7, %v2552_v2 }
  0xda   : > { %v498_v11 = vpop.f32.mrf.mxu0 }
  0xdb   : > { %v2566_v12 = vadd.f32 %v2552_v2, %v498_v11  ;;  %2005 = vmatprep.mubr.f32.mxu1 %v647_v8  ;;  %v650_v15 = vmax.f32 %v2563_v10, 0.0 }
  0xdc   : > { %v1933_v13 = vpop.f32.mrf.mxu0  ;;  %2006 = vmatmul.mubr.f32.vlgmr.msra.gmra.mxu1 %v648_v9 }
  0xdd   : > { %v649_v14 = vmax.f32 %v2566_v12, 0.0  ;;  %v2575_v16 = vadd.f32 %v1933_v13, %v2552_v2 }
  0xde   : > { %v508_v17 = vpop.f32.mrf.mxu0 }
  0xdf   : > { %v2578_v18 = vadd.f32 %v2552_v2, %v508_v17  ;;  %2008 = vmatprep.mubr.f32.mxu1 %v649_v14  ;;  %v652_v21 = vmax.f32 %v2575_v16, 0.0 }
  0xe0   : > { %v1936_v19 = vpop.f32.mrf.mxu0  ;;  %2009 = vmatmul.mubr.f32.gmra.mxu1 %v650_v15 }
  0xe1   : > { %v651_v20 = vmax.f32 %v2578_v18, 0.0  ;;  %v2587_v22 = vadd.f32 %v1936_v19, %v2552_v2 }
  0xe2   : > { %v518_v23 = vpop.f32.mrf.mxu0 }
  0xe3   : > { %v2590_v24 = vadd.f32 %v2552_v2, %v518_v23  ;;  %2011 = vmatprep.mubr.f32.mxu1 %v651_v20  ;;  %v654_v27 = vmax.f32 %v2587_v22, 0.0 }
  0xe4   : > { %v1939_v25 = vpop.f32.mrf.mxu0  ;;  %2012 = vmatmul.mubr.f32.gmra.mxu1 %v652_v21 }
  0xe5   : > { %v653_v26 = vmax.f32 %v2590_v24, 0.0  ;;  %v2599_v28 = vadd.f32 %v1939_v25, %v2552_v2 }
  0xe6   : > { %v528_v29 = vpop.f32.mrf.mxu0 }
  0xe7   : > { %v2602_v30 = vadd.f32 %v2552_v2, %v528_v29  ;;  %2014 = vmatprep.mubr.f32.mxu1 %v653_v26  ;;  %v656_v33 = vmax.f32 %v2599_v28, 0.0 }
  0xe8   : > { %v1942_v31 = vpop.f32.mrf.mxu0  ;;  %2015 = vmatmul.mubr.f32.gmra.mxu1 %v654_v27 }
  0xe9   : > { %v3325_v32 = vmax.f32 %v2602_v30, 0.0  ;;  %v2611_v34 = vadd.f32 %v1942_v31, %v2552_v2 }
  0xea   : > { %v538_v35 = vpop.f32.mrf.mxu0 }
  0xeb   : > { %v2614_v36 = vadd.f32 %v2552_v2, %v538_v35  ;;  %2017 = vmatprep.mubr.f32.mxu1 %v3325_v32  ;;  %v3324_v39 = vmax.f32 %v2611_v34, 0.0 }
  0xec   : > { %v1945_v37 = vpop.f32.mrf.mxu0  ;;  %2018 = vmatmul.mubr.f32.gmra.mxu1 %v656_v33 }
  0xed   : > { %v3323_v38 = vmax.f32 %v2614_v36, 0.0  ;;  %v2623_v40 = vadd.f32 %v1945_v37, %v2552_v2 }
  0xee   : > { %v548_v41 = vpop.f32.mrf.mxu0 }
  0xef   : > { %v2626_v42 = vadd.f32 %v2552_v2, %v548_v41  ;;  %2020 = vmatprep.mubr.f32.mxu1 %v3323_v38  ;;  %v3322_v45 = vmax.f32 %v2623_v40, 0.0 }
  0xf0   : > { %v1948_v43 = vpop.f32.mrf.mxu0  ;;  %2021 = vmatmul.mubr.f32.gmra.mxu1 %v3324_v39 }
  0xf1   : > { %v3321_v44 = vmax.f32 %v2626_v42, 0.0  ;;  %v2635_v46 = vadd.f32 %v1948_v43, %v2552_v2 }
  0xf2   : > { %v558_v47 = vpop.f32.mrf.mxu0 }
  0xf3   : > { %v2638_v48 = vadd.f32 %v2552_v2, %v558_v47  ;;  %2023 = vmatprep.mubr.f32.mxu1 %v3321_v44  ;;  %v3320_v51 = vmax.f32 %v2635_v46, 0.0 }
  0xf4   : > { %v1951_v49 = vpop.f32.mrf.mxu0  ;;  %2024 = vmatmul.mubr.f32.gmra.mxu1 %v3322_v45 }
  0xf5   : > { %v3319_v50 = vmax.f32 %v2638_v48, 0.0  ;;  %v2647_v52 = vadd.f32 %v1951_v49, %v2552_v2 }
  0xf6   : > { %v568_v53 = vpop.f32.mrf.mxu0 }
  0xf7   : > { %v2650_v54 = vadd.f32 %v2552_v2, %v568_v53  ;;  %2026 = vmatprep.mubr.f32.mxu1 %v3319_v50  ;;  %v3318_v57 = vmax.f32 %v2647_v52, 0.0 }
  0xf8   : > { %v1954_v55 = vpop.f32.mrf.mxu0  ;;  %2027 = vmatmul.mubr.f32.gmra.mxu1 %v3320_v51 }
  0xf9   : > { %v3317_v56 = vmax.f32 %v2650_v54, 0.0  ;;  %v2659_v58 = vadd.f32 %v1954_v55, %v2552_v2 }
  0xfa   : > { %v578_v59 = vpop.f32.mrf.mxu0 }
  0xfb   : > { %v2662_v60 = vadd.f32 %v2552_v2, %v578_v59  ;;  %2029 = vmatprep.mubr.f32.mxu1 %v3317_v56  ;;  %v3316_v63 = vmax.f32 %v2659_v58, 0.0 }
  0xfc   : > { %v1957_v61 = vpop.f32.mrf.mxu0  ;;  %2030 = vmatmul.mubr.f32.gmra.mxu1 %v3318_v57 }
  0xfd   : > { %v3315_v62 = vmax.f32 %v2662_v60, 0.0  ;;  %v2671_v0 = vadd.f32 %v1957_v61, %v2552_v2 }
  0xfe   : > { %v588_v1 = vpop.f32.mrf.mxu0 }
  0xff   : > { %v2674_v3 = vadd.f32 %v2552_v2, %v588_v1  ;;  %2032 = vmatprep.mubr.f32.mxu1 %v3315_v62  ;;  %v3314_v11 = vmax.f32 %v2671_v0, 0.0 }
 0x100   : > { %v1960_v5 = vpop.f32.mrf.mxu0  ;;  %2033 = vmatmul.mubr.f32.gmra.mxu1 %v3316_v63 }
 0x101   : > { %v3313_v7 = vmax.f32 %v2674_v3, 0.0  ;;  %v2683_v13 = vadd.f32 %v1960_v5, %v2552_v2 }
 0x102   : > { %v598_v17 = vpop.f32.mrf.mxu0 }
 0x103   : > { %v2686_v19 = vadd.f32 %v2552_v2, %v598_v17  ;;  %2035 = vmatprep.mubr.f32.mxu1 %v3313_v7  ;;  %v3312_v29 = vmax.f32 %v2683_v13, 0.0  ;;  %v2817_v7 = vld [vmem:[%s3300_s5 + $0x28] sm:$0xff] }
 0x104   : > { %v1963_v23 = vpop.f32.mrf.mxu0  ;;  %2036 = vmatmul.mubr.f32.gmra.mxu1 %v3314_v11  ;;  %v2824_v11 = vld [vmem:[%s3299_s4] ss:$0 sm:$0xff] }
 0x105   : > { %v3311_v25 = vmax.f32 %v2686_v19, 0.0  ;;  %v2695_v31 = vadd.f32 %v1963_v23, %v2552_v2 }
 0x106   : > { %v608_v35 = vpop.f32.mrf.mxu0 }
 0x107   : > { %v2698_v37 = vadd.f32 %v2552_v2, %v608_v35  ;;  %2038 = vmatprep.mubr.f32.mxu1 %v3311_v25  ;;  %v3304_v47 = vmax.f32 %v2695_v31, 0.0  ;;  %v2803_v25 = vld [vmem:[%s3300_s5 + $0x38] sm:$0xff] }
 0x108   : > { %v1966_v41 = vpop.f32.mrf.mxu0  ;;  %2039 = vmatmul.mubr.f32.gmra.mxu1 %v3312_v29  ;;  %v2810_v29 = vld [vmem:[%s3300_s5 + $0x30] sm:$0xff] }
 0x109   : > { %v3303_v43 = vmax.f32 %v2698_v37, 0.0  ;;  %v2707_v49 = vadd.f32 %v1966_v41, %v2552_v2 }
 0x10a   : > { %v618_v53 = vpop.f32.mrf.mxu0 }
 0x10b   : > { %v2710_v55 = vadd.f32 %v2552_v2, %v618_v53  ;;  %2041 = vmatprep.mubr.f32.mxu1 %v3303_v43  ;;  %v3310_v1 = vmax.f32 %v2707_v49, 0.0 }
 0x10c   : > { %v1969_v59 = vpop.f32.mrf.mxu0  ;;  %2042 = vmatmul.mubr.f32.gmra.mxu1 %v3304_v47 }
 0x10d   : > { %v3305_v61 = vmax.f32 %v2710_v55, 0.0  ;;  %v2719_v5 = vadd.f32 %v1969_v59, %v2552_v2 }
 0x10e   : > { %v628_v17 = vpop.f32.mrf.mxu0 }
 0x10f   : > { %v2722_v23 = vadd.f32 %v2552_v2, %v628_v17  ;;  %2044 = vmatprep.mubr.f32.mxu1 %v3305_v61  ;;  %v3309_v53 = vmax.f32 %v2719_v5, 0.0 }
 0x110   : > { %v1972_v35 = vpop.f32.mrf.mxu0  ;;  %2045 = vmatmul.mubr.f32.gmra.mxu1 %v3310_v1  ;;  %v2796_v1 = vld [vmem:[%s3300_s5 + $0x40] sm:$0xff] }
 0x111   : > { %v3308_v41 = vmax.f32 %v2722_v23, 0.0  ;;  %v2731_v43 = vadd.f32 %v1972_v35, %v2552_v2  ;;  %v1716_v35 = vld [vmem:[%s3298_s3 + $0x80] sm:$0xff] }
 0x112   : > { %v638_v59 = vpop.f32.mrf.mxu0 }
 0x113   : > { %v2734_v47 = vadd.f32 %v2552_v2, %v638_v59  ;;  %2047 = vmatprep.mubr.f32.mxu1 %v3308_v41  ;;  %v3307_v61 = vmax.f32 %v2731_v43, 0.0  ;;  %v1717_v2 = vld [vmem:[%s3298_s3 + $0x88] sm:$0xff]  ;;  %v1320_v59 = vld [vmem:[%s3300_s5 + $0x78] sm:$0xff]  ;;  %v2782_v41 = vld [vmem:[%s3300_s5 + $0x50] sm:$0xff] }
 0x114   : > { %2048 = vmatmul.mubr.f32.gmra.mxu1 %v3309_v53  ;;  %2081 = vmatprep.subr.mxu0 %v1717_v2  ;;  %v2789_v53 = vld [vmem:[%s3300_s5 + $0x48] sm:$0xff] }
 0x115   : > { %v3306_v17 = vmax.f32 %v2734_v47, 0.0  ;;  %2082 = vmatpush3.msra.mxu0 %v1717_v2  ;;  %2213 = vmatprep.subr.mxu1 %v1320_v59  ;;  %v2761_v2 = vld [vmem:[%s3300_s5 + $0x68] sm:$0xff] }
 0x116   : > { %2083 = vmatprep.subr.mxu0 %v1716_v35  ;;  %2229 = vmatpush3.msra.mxu1 %v1320_v59 }
 0x117   : > { %2050 = vmatprep.mubr.f32.mxu1 %v3306_v17  ;;  %2084 = vmatpush3.msra.mxu0 %v1716_v35  ;;  %v1319_v17 = vld [vmem:[%s3300_s5 + $0x70] sm:$0xff]  ;;  %v2768_v35 = vld [vmem:[%s3300_s5 + $0x60] sm:$0xff] }
 0x118   : > { %2051 = vmatmul.mubr.f32.gmra.mxu1 %v3307_v61  ;;  %2133 = vmatprep.subr.mxu0 %v1320_v59  ;;  %v2775_v61 = vld [vmem:[%s3300_s5 + $0x58] sm:$0xff] }
 0x119   : > { %2214 = vmatprep.subr.mxu1 %v1319_v17 }
 0x11a   : > { %2230 = vmatpush3.msra.mxu1 %v1319_v17 }
 0x11b   : > { %2215 = vmatprep.subr.mxu1 %v2761_v2 }
 0x11c   : > { %2231 = vmatpush3.msra.mxu1 %v2761_v2 }
 0x11d   : > { %2216 = vmatprep.subr.mxu1 %v2768_v35 }
 0x11e   : > { %2232 = vmatpush3.msra.mxu1 %v2768_v35 }
 0x11f   : > { %2217 = vmatprep.subr.mxu1 %v2775_v61 }
 0x120   : > { %2233 = vmatpush3.msra.mxu1 %v2775_v61 }
 0x121   : > { %2218 = vmatprep.subr.mxu1 %v2782_v41 }
 0x122   : > { %2234 = vmatpush3.msra.mxu1 %v2782_v41 }
 0x123   : > { %2219 = vmatprep.subr.mxu1 %v2789_v53 }
 0x124   : > { %2235 = vmatpush3.msra.mxu1 %v2789_v53 }
 0x125   : > { %2220 = vmatprep.subr.mxu1 %v2796_v1 }
 0x126   : > { %2236 = vmatpush3.msra.mxu1 %v2796_v1 }
 0x127   : > { %2221 = vmatprep.subr.mxu1 %v2803_v25 }
 0x128   : > { %2237 = vmatpush3.msra.mxu1 %v2803_v25 }
 0x129   : > { %2222 = vmatprep.subr.mxu1 %v2810_v29 }
 0x12a   : > { %2238 = vmatpush3.msra.mxu1 %v2810_v29 }
 0x12b   : > { %2223 = vmatprep.subr.mxu1 %v2817_v7 }
 0x12c   : > { %2239 = vmatpush3.msra.mxu1 %v2817_v7 }
 0x19c   : > { %v2007_v62 = vpop.f32.mrf.mxu1 }
 0x19d   : > { %v774_v63 = vadd.f32 %v2007_v62, %v2824_v11 }
 0x19e   : > { %v768_v56 = vpop.f32.mrf.mxu1 }
 0x19f   : > { %v769_v57 = vadd.f32 %v2824_v11, %v768_v56  ;;  %v2830_v50 = vadd.f32 %v774_v63, %v648_v9 }
 0x1a0   : > { %v2010_v51 = vpop.f32.mrf.mxu1 }
 0x1a1   : > { %v2834_v44 = vadd.f32 %v769_v57, %v647_v8  ;;  %v784_v45 = vadd.f32 %v2010_v51, %v2824_v11  ;;  %v960_v62 = vmax.f32 %v2830_v50, 0.0 }
 0x1a2   : > { %v778_v38 = vpop.f32.mrf.mxu1 }
 0x1a3   : > { %v959_v39 = vmax.f32 %v2834_v44, 0.0  ;;  %v779_v32 = vadd.f32 %v2824_v11, %v778_v38  ;;  %v2842_v56 = vadd.f32 %v784_v45, %v650_v15 }
 0x1a4   : > { %v2013_v4 = vpop.f32.mrf.mxu1 }
 0x1a5   : > { %v2846_v9 = vadd.f32 %v779_v32, %v649_v14  ;;  %v794_v6 = vadd.f32 %v2013_v4, %v2824_v11  ;;  %2085 = vmatprep.mubr.f32.mxu0 %v959_v39  ;;  %v962_v15 = vmax.f32 %v2842_v56, 0.0 }
 0x1a6   : > { %v788_v8 = vpop.f32.mrf.mxu1  ;;  %2086 = vmatmul.mubr.f32.vlgmr.msra.gmra.mxu0 %v960_v62 }
 0x1a7   : > { %v961_v38 = vmax.f32 %v2846_v9, 0.0  ;;  %v789_v10 = vadd.f32 %v2824_v11, %v788_v8  ;;  %2134 = vmatpush3.msra.mxu0 %v1320_v59  ;;  %v2858_v12 = vadd.f32 %v794_v6, %v652_v21  ;;  %v3341_v8 = vmax.f32 %v2611_v34, 0.0 }
 0x1a8   : > { %v2016_v14 = vpop.f32.mrf.mxu1  ;;  %2135 = vmatprep.subr.mxu0 %v1319_v17 }
 0x1a9   : > { %v2862_v32 = vadd.f32 %v789_v10, %v651_v20  ;;  %v804_v45 = vadd.f32 %v2016_v14, %v2824_v11  ;;  %2088 = vmatprep.mubr.f32.mxu0 %v961_v38  ;;  %2136 = vmatpush3.msra.mxu0 %v1319_v17  ;;  %v964_v18 = vmax.f32 %v2858_v12, 0.0 }
 0x1aa   : > { %v798_v51 = vpop.f32.mrf.mxu1  ;;  %2089 = vmatmul.mubr.f32.gmra.mxu0 %v962_v15  ;;  %2137 = vmatprep.subr.mxu0 %v2761_v2 }
 0x1ab   : > { %v963_v16 = vmax.f32 %v2862_v32, 0.0  ;;  %v799_v21 = vadd.f32 %v2824_v11, %v798_v51  ;;  %2138 = vmatpush3.msra.mxu0 %v2761_v2  ;;  %v2876_v20 = vadd.f32 %v804_v45, %v654_v27 }
 0x1ac   : > { %v2019_v57 = vpop.f32.mrf.mxu1  ;;  %2139 = vmatprep.subr.mxu0 %v2768_v35 }
 0x1ad   : > { %v2881_v63 = vadd.f32 %v799_v21, %v653_v26  ;;  %v814_v17 = vadd.f32 %v2019_v57, %v2824_v11  ;;  %2091 = vmatprep.mubr.f32.mxu0 %v963_v16  ;;  %2140 = vmatpush3.msra.mxu0 %v2768_v35  ;;  %v966_v24 = vmax.f32 %v2876_v20, 0.0  ;;  %v3340_v35 = vmax.f32 %v2602_v30, 0.0 }
 0x1ae   : > { %v808_v59 = vpop.f32.mrf.mxu1  ;;  %2092 = vmatmul.mubr.f32.gmra.mxu0 %v964_v18  ;;  %2141 = vmatprep.subr.mxu0 %v2775_v61  ;;  %v3343_v57 = vmax.f32 %v2623_v40, 0.0 }
 0x1af   : > { %v965_v22 = vmax.f32 %v2881_v63, 0.0  ;;  %v809_v27 = vadd.f32 %v2824_v11, %v808_v59  ;;  %2142 = vmatpush3.msra.mxu0 %v2775_v61  ;;  %v2896_v26 = vadd.f32 %v814_v17, %v656_v33 }
 0x1b0   : > { %v2022_v2 = vpop.f32.mrf.mxu1  ;;  %2143 = vmatprep.subr.mxu0 %v2782_v41 }
 0x1b1   : > { %v2901_v4 = vadd.f32 %v809_v27, %v3340_v35  ;;  %v824_v6 = vadd.f32 %v2022_v2, %v2824_v11  ;;  %2094 = vmatprep.mubr.f32.mxu0 %v965_v22  ;;  %2144 = vmatpush3.msra.mxu0 %v2782_v41  ;;  %v968_v30 = vmax.f32 %v2896_v26, 0.0  ;;  %v3342_v41 = vmax.f32 %v2614_v36, 0.0 }
 0x1b2   : > { %v818_v61 = vpop.f32.mrf.mxu1  ;;  %2095 = vmatmul.mubr.f32.gmra.mxu0 %v966_v24  ;;  %2145 = vmatprep.subr.mxu0 %v2789_v53 }
 0x1b3   : > { %v967_v28 = vmax.f32 %v2901_v4, 0.0  ;;  %v819_v33 = vadd.f32 %v2824_v11, %v818_v61  ;;  %2146 = vmatpush3.msra.mxu0 %v2789_v53  ;;  %v2916_v10 = vadd.f32 %v824_v6, %v3341_v8  ;;  %v3345_v6 = vmax.f32 %v2635_v46, 0.0 }
 0x1b4   : > { %v2025_v14 = vpop.f32.mrf.mxu1  ;;  %2147 = vmatprep.subr.mxu0 %v2796_v1 }
 0x1b5   : > { %v2921_v45 = vadd.f32 %v819_v33, %v3342_v41  ;;  %v834_v51 = vadd.f32 %v2025_v14, %v2824_v11  ;;  %2097 = vmatprep.mubr.f32.mxu0 %v967_v28  ;;  %2148 = vmatpush3.msra.mxu0 %v2796_v1  ;;  %v970_v36 = vmax.f32 %v2916_v10, 0.0  ;;  %v3344_v1 = vmax.f32 %v2626_v42, 0.0 }
 0x1b6   : > { %v828_v53 = vpop.f32.mrf.mxu1  ;;  %2098 = vmatmul.mubr.f32.gmra.mxu0 %v968_v30  ;;  %2149 = vmatprep.subr.mxu0 %v2803_v25 }
 0x1b7   : > { %v969_v34 = vmax.f32 %v2921_v45, 0.0  ;;  %v829_v21 = vadd.f32 %v2824_v11, %v828_v53  ;;  %2150 = vmatpush3.msra.mxu0 %v2803_v25  ;;  %v2936_v17 = vadd.f32 %v834_v51, %v3343_v57  ;;  %v3347_v53 = vmax.f32 %v2647_v52, 0.0 }
 0x1b8   : > { %v2028_v59 = vpop.f32.mrf.mxu1  ;;  %2151 = vmatprep.subr.mxu0 %v2810_v29  ;;  %v3348_v57 = vmax.f32 %v2650_v54, 0.0 }
 0x1b9   : > { %v2941_v27 = vadd.f32 %v829_v21, %v3344_v1  ;;  %v844_v2 = vadd.f32 %v2028_v59, %v2824_v11  ;;  %2100 = vmatprep.mubr.f32.mxu0 %v969_v34  ;;  %2152 = vmatpush3.msra.mxu0 %v2810_v29  ;;  %v972_v42 = vmax.f32 %v2936_v17, 0.0  ;;  %v3346_v29 = vmax.f32 %v2638_v48, 0.0 }
 0x1ba   : > { %v838_v25 = vpop.f32.mrf.mxu1  ;;  %2101 = vmatmul.mubr.f32.gmra.mxu0 %v970_v36  ;;  %2153 = vmatprep.subr.mxu0 %v2817_v7 }
 0x1bb   : > { %v971_v40 = vmax.f32 %v2941_v27, 0.0  ;;  %v839_v35 = vadd.f32 %v2824_v11, %v838_v25  ;;  %2154 = vmatpush3.msra.mxu0 %v2817_v7  ;;  %v2956_v61 = vadd.f32 %v844_v2, %v3345_v6  ;;  %v3349_v6 = vmax.f32 %v2659_v58, 0.0 }
 0x1bc   : > { %v2031_v33 = vpop.f32.mrf.mxu1 }
 0x1bd   : > { %v2960_v8 = vadd.f32 %v839_v35, %v3346_v29  ;;  %v854_v14 = vadd.f32 %v2031_v33, %v2824_v11  ;;  %2103 = vmatprep.mubr.f32.mxu0 %v971_v40  ;;  %v974_v51 = vmax.f32 %v2956_v61, 0.0  ;;  %v3350_v29 = vmax.f32 %v2662_v60, 0.0 }
 0x1be   : > { %v848_v41 = vpop.f32.mrf.mxu1  ;;  %2104 = vmatmul.mubr.f32.gmra.mxu0 %v972_v42 }
 0x1bf   : > { %v973_v7 = vmax.f32 %v2960_v8, 0.0  ;;  %v849_v46 = vadd.f32 %v2824_v11, %v848_v41  ;;  %v2972_v48 = vadd.f32 %v854_v14, %v3347_v53 }
 0x1c0   : > { %v2034_v21 = vpop.f32.mrf.mxu1 }
 0x1c1   : > { %v2976_v59 = vadd.f32 %v849_v46, %v3348_v57  ;;  %v864_v1 = vadd.f32 %v2034_v21, %v2824_v11  ;;  %2106 = vmatprep.mubr.f32.mxu0 %v973_v7  ;;  %v976_v35 = vmax.f32 %v2972_v48, 0.0  ;;  %v3351_v57 = vmax.f32 %v2671_v0, 0.0 }
 0x1c2   : > { %v858_v2 = vpop.f32.mrf.mxu1  ;;  %2107 = vmatmul.mubr.f32.gmra.mxu0 %v974_v51 }
 0x1c3   : > { %v975_v25 = vmax.f32 %v2976_v59, 0.0  ;;  %v859_v52 = vadd.f32 %v2824_v11, %v858_v2  ;;  %v2988_v54 = vadd.f32 %v864_v1, %v3349_v6  ;;  %v3352_v2 = vmax.f32 %v2674_v3, 0.0 }
 0x1c4   : > { %v2037_v33 = vpop.f32.mrf.mxu1 }
 0x1c5   : > { %v2992_v14 = vadd.f32 %v859_v52, %v3350_v29  ;;  %v874_v41 = vadd.f32 %v2037_v33, %v2824_v11  ;;  %2109 = vmatprep.mubr.f32.mxu0 %v975_v25  ;;  %v3339_v21 = vmax.f32 %v2988_v54, 0.0 }
 0x1c6   : > { %v868_v46 = vpop.f32.mrf.mxu1  ;;  %2110 = vmatmul.mubr.f32.gmra.mxu0 %v976_v35 }
 0x1c7   : > { %v3326_v53 = vmax.f32 %v2992_v14, 0.0  ;;  %v869_v58 = vadd.f32 %v2824_v11, %v868_v46  ;;  %v3004_v60 = vadd.f32 %v874_v41, %v3351_v57  ;;  %v3353_v46 = vmax.f32 %v2683_v13, 0.0 }
 0x1c8   : > { %v2040_v1 = vpop.f32.mrf.mxu1  ;;  %v3354_v57 = vmax.f32 %v2686_v19, 0.0  ;;  %v3364_v48 = vmax.f32 %v2992_v14, 0.0 }
 0x1c9   : > { %v3008_v52 = vadd.f32 %v869_v58, %v3352_v2  ;;  %v884_v6 = vadd.f32 %v2040_v1, %v2824_v11  ;;  %2112 = vmatprep.mubr.f32.mxu0 %v3326_v53  ;;  %v3328_v41 = vmax.f32 %v3004_v60, 0.0 }
 0x1ca   : > { %v878_v33 = vpop.f32.mrf.mxu1  ;;  %2113 = vmatmul.mubr.f32.gmra.mxu0 %v3339_v21 }
 0x1cb   : > { %v3327_v29 = vmax.f32 %v3008_v52, 0.0  ;;  %v879_v0 = vadd.f32 %v2824_v11, %v878_v33  ;;  %v3020_v3 = vadd.f32 %v884_v6, %v3353_v46  ;;  %v3355_v46 = vmax.f32 %v2695_v31, 0.0 }
 0x1cc   : > { %v2043_v58 = vpop.f32.mrf.mxu1 }
 0x1cd   : > { %v3024_v1 = vadd.f32 %v879_v0, %v3354_v57  ;;  %v894_v2 = vadd.f32 %v2043_v58, %v2824_v11  ;;  %2115 = vmatprep.mubr.f32.mxu0 %v3327_v29  ;;  %v3330_v6 = vmax.f32 %v3020_v3, 0.0  ;;  %v3356_v58 = vmax.f32 %v2698_v37, 0.0 }
 0x1ce   : > { %v888_v53 = vpop.f32.mrf.mxu1  ;;  %2116 = vmatmul.mubr.f32.gmra.mxu0 %v3328_v41 }
 0x1cf   : > { %v3329_v33 = vmax.f32 %v3024_v1, 0.0  ;;  %v889_v13 = vadd.f32 %v2824_v11, %v888_v53  ;;  %v3036_v19 = vadd.f32 %v894_v2, %v3355_v46  ;;  %v3357_v46 = vmax.f32 %v2707_v49, 0.0 }
 0x1d0   : > { %v2046_v0 = vpop.f32.mrf.mxu1 }
 0x1d1   : > { %v3040_v57 = vadd.f32 %v889_v13, %v3356_v58  ;;  %v904_v29 = vadd.f32 %v2046_v0, %v2824_v11  ;;  %2118 = vmatprep.mubr.f32.mxu0 %v3329_v33  ;;  %v3332_v2 = vmax.f32 %v3036_v19, 0.0  ;;  %v3358_v0 = vmax.f32 %v2710_v55, 0.0 }
 0x1d2   : > { %v898_v41 = vpop.f32.mrf.mxu1  ;;  %2119 = vmatmul.mubr.f32.gmra.mxu0 %v3330_v6 }
 0x1d3   : > { %v3331_v53 = vmax.f32 %v3040_v57, 0.0  ;;  %v899_v31 = vadd.f32 %v2824_v11, %v898_v41  ;;  %v3052_v37 = vadd.f32 %v904_v29, %v3357_v46  ;;  %v3359_v46 = vmax.f32 %v2719_v5, 0.0 }
 0x1d4   : > { %v2049_v13 = vpop.f32.mrf.mxu1 }
 0x1d5   : > { %v3056_v58 = vadd.f32 %v899_v31, %v3358_v0  ;;  %v914_v33 = vadd.f32 %v2049_v13, %v2824_v11  ;;  %2121 = vmatprep.mubr.f32.mxu0 %v3331_v53  ;;  %v3338_v29 = vmax.f32 %v3052_v37, 0.0  ;;  %v3360_v13 = vmax.f32 %v2722_v23, 0.0 }
 0x1d6   : > { %v908_v6 = vpop.f32.mrf.mxu1  ;;  %2122 = vmatmul.mubr.f32.gmra.mxu0 %v3332_v2 }
 0x1d7   : > { %v3337_v41 = vmax.f32 %v3056_v58, 0.0  ;;  %v909_v49 = vadd.f32 %v2824_v11, %v908_v6  ;;  %v3068_v55 = vadd.f32 %v914_v33, %v3359_v46  ;;  %v3361_v46 = vmax.f32 %v2731_v43, 0.0  ;;  %v1309_v43 = vld [vmem:[%s3300_s5 + $0x20] sm:$0xff] }
 0x1d8   : > { %v2052_v31 = vpop.f32.mrf.mxu1  ;;  %2155 = vmatprep.subr.mxu0 %v1309_v43  ;;  %2224 = vmatprep.subr.mxu1 %v1309_v43 }
 0x1d9   : > { %v3072_v0 = vadd.f32 %v909_v49, %v3360_v13  ;;  %v924_v53 = vadd.f32 %v2052_v31, %v2824_v11  ;;  %2124 = vmatprep.mubr.f32.mxu0 %v3337_v41  ;;  %v3336_v33 = vmax.f32 %v3068_v55, 0.0  ;;  %v3362_v49 = vmax.f32 %v2734_v47, 0.0  ;;  %2156 = vmatpush3.msra.mxu0 %v1309_v43  ;;  %v1308_v47 = vld [vmem:[%s3300_s5 + $0x18] sm:$0xff] }
 0x1da   : > { %v918_v2 = vpop.f32.mrf.mxu1  ;;  %2125 = vmatmul.mubr.f32.gmra.mxu0 %v3338_v29  ;;  %2240 = vmatpush3.msra.mxu1 %v1309_v43 }
 0x1db   : > { %v3335_v6 = vmax.f32 %v3072_v0, 0.0  ;;  %v919_v5 = vadd.f32 %v2824_v11, %v918_v2  ;;  %v3084_v23 = vadd.f32 %v924_v53, %v3361_v46  ;;  %2157 = vmatprep.subr.mxu0 %v1308_v47  ;;  %2225 = vmatprep.subr.mxu1 %v1308_v47  ;;  %v1307_v53 = vld [vmem:[%s3300_s5 + $0x10] sm:$0xff]  ;;  %v1306_v2 = vld [vmem:[%s3300_s5 + $0x8] sm:$0xff]  ;;  %v3118_v46 = vld [vmem:[%s3299_s4 + $0x1] ss:$0 sm:$0xff] }
 0x1dc   : > { %2158 = vmatpush3.msra.mxu0 %v1308_v47  ;;  %2241 = vmatpush3.msra.mxu1 %v1308_v47 }
 0x1dd   : > { %v3088_v31 = vadd.f32 %v919_v5, %v3362_v49  ;;  %2127 = vmatprep.mubr.f32.mxu0 %v3335_v6  ;;  %v3334_v11 = vmax.f32 %v3084_v23, 0.0  ;;  %2159 = vmatprep.subr.mxu0 %v1307_v53  ;;  %v1305_v5 = vld [vmem:[%s3300_s5] sm:$0xff] }
 0x1de   : > { %2128 = vmatmul.mubr.f32.gmra.mxu0 %v3336_v33  ;;  %2226 = vmatprep.subr.mxu1 %v1307_v53 }
 0x1df   : > { %v3333_v13 = vmax.f32 %v3088_v31, 0.0  ;;  %2160 = vmatpush3.msra.mxu0 %v1307_v53  ;;  %2242 = vmatpush3.msra.mxu1 %v1307_v53 }
 0x1e0   : > { %2161 = vmatprep.subr.mxu0 %v1306_v2  ;;  %2227 = vmatprep.subr.mxu1 %v1306_v2 }
 0x1e1   : > { %2130 = vmatprep.mubr.f32.mxu0 %v3333_v13  ;;  %2162 = vmatpush3.msra.mxu0 %v1306_v2 }
 0x1e2   : > { %2131 = vmatmul.mubr.f32.gmra.mxu0 %v3334_v11  ;;  %2243 = vmatpush3.msra.mxu1 %v1306_v2 }
 0x1e3   : > { %2163 = vmatprep.subr.mxu0 %v1305_v5  ;;  %2228 = vmatprep.subr.mxu1 %v1305_v5 }
 0x1e4   : > { %2164 = vmatpush3.msra.mxu0 %v1305_v5  ;;  %2244 = vmatpush3.msra.mxu1 %v1305_v5 }
 0x266   : > { %v2087_v49 = vpop.f32.mrf.mxu0 }
 0x267   : > { %v1088_v43 = vadd.f32 %v2087_v49, %v3118_v46 }
 0x268   : > { %v1082_v47 = vpop.f32.mrf.mxu0 }
 0x269   : > { %v1083_v53 = vadd.f32 %v3118_v46, %v1082_v47  ;;  %v1242_v13 = vadd.f32 %v1088_v43, %v960_v62 }
 0x26a   : > { %v2090_v11 = vpop.f32.mrf.mxu0 }
 0x26b   : > { %v1241_v2 = vadd.f32 %v1083_v53, %v959_v39  ;;  %v1098_v5 = vadd.f32 %v2090_v11, %v3118_v46  ;;  %v1274_v29 = vmax.f32 %v1242_v13, 0.0 }
 0x26c   : > { %v1092_v6 = vpop.f32.mrf.mxu0 }
 0x26d   : > { %v1273_v33 = vmax.f32 %v1241_v2, 0.0  ;;  %v1093_v41 = vadd.f32 %v3118_v46, %v1092_v6  ;;  %v1244_v49 = vadd.f32 %v1098_v5, %v962_v15 }
 0x26e   : > { %v2093_v21 = vpop.f32.mrf.mxu0 }
 0x26f   : > { %v1243_v47 = vadd.f32 %v1093_v41, %v961_v38  ;;  %v1108_v50 = vadd.f32 %v2093_v21, %v3118_v46  ;;  %2165 = vmatprep.mubr.f32.mxu0 %v1273_v33  ;;  %v1276_v11 = vmax.f32 %v1244_v49, 0.0 }
 0x270   : > { %v1102_v62 = vpop.f32.mrf.mxu0  ;;  %2166 = vmatmul.mubr.f32.vlgmr.msra.gmra.mxu0 %v1274_v29 }
 0x271   : > { %v1275_v39 = vmax.f32 %v1243_v47, 0.0  ;;  %v1103_v44 = vadd.f32 %v3118_v46, %v1102_v62  ;;  %v1246_v6 = vadd.f32 %v1108_v50, %v964_v18 }
 0x272   : > { %v2096_v13 = vpop.f32.mrf.mxu0 }
 0x273   : > { %v1245_v56 = vadd.f32 %v1103_v44, %v963_v16  ;;  %v1118_v15 = vadd.f32 %v2096_v13, %v3118_v46  ;;  %2168 = vmatprep.mubr.f32.mxu0 %v1275_v39  ;;  %v1278_v41 = vmax.f32 %v1246_v6, 0.0 }
 0x274   : > { %v1112_v9 = vpop.f32.mrf.mxu0  ;;  %2169 = vmatmul.mubr.f32.gmra.mxu0 %v1276_v11 }
 0x275   : > { %v1277_v38 = vmax.f32 %v1245_v56, 0.0  ;;  %v1113_v21 = vadd.f32 %v3118_v46, %v1112_v9  ;;  %v1248_v29 = vadd.f32 %v1118_v15, %v966_v24 }
 0x276   : > { %v2099_v33 = vpop.f32.mrf.mxu0 }
 0x277   : > { %v1247_v12 = vadd.f32 %v1113_v21, %v965_v22  ;;  %v1128_v18 = vadd.f32 %v2099_v33, %v3118_v46  ;;  %2171 = vmatprep.mubr.f32.mxu0 %v1277_v38  ;;  %v1280_v53 = vmax.f32 %v1248_v29, 0.0 }
 0x278   : > { %v1122_v32 = vpop.f32.mrf.mxu0  ;;  %2172 = vmatmul.mubr.f32.gmra.mxu0 %v1278_v41 }
 0x279   : > { %v1279_v16 = vmax.f32 %v1247_v12, 0.0  ;;  %v1123_v43 = vadd.f32 %v3118_v46, %v1122_v32  ;;  %v1250_v2 = vadd.f32 %v1128_v18, %v968_v30  ;;  %v3363_v18 = vmax.f32 %v2988_v54, 0.0 }
 0x27a   : > { %v2102_v5 = vpop.f32.mrf.mxu0  ;;  %v3366_v54 = vmax.f32 %v3008_v52, 0.0 }
 0x27b   : > { %v1249_v20 = vadd.f32 %v1123_v43, %v967_v28  ;;  %v1138_v24 = vadd.f32 %v2102_v5, %v3118_v46  ;;  %2174 = vmatprep.mubr.f32.mxu1 %v1279_v16  ;;  %v1282_v47 = vmax.f32 %v1250_v2, 0.0  ;;  %v3365_v5 = vmax.f32 %v3004_v60, 0.0 }
 0x27c   : > { %v1132_v63 = vpop.f32.mrf.mxu0  ;;  %2175 = vmatmul.mubr.f32.vlgmr.msra.gmra.mxu1 %v1280_v53  ;;  %v3368_v60 = vmax.f32 %v3024_v1, 0.0 }
 0x27d   : > { %v1281_v22 = vmax.f32 %v1249_v20, 0.0  ;;  %v1133_v49 = vadd.f32 %v3118_v46, %v1132_v63  ;;  %v1252_v50 = vadd.f32 %v1138_v24, %v970_v36 }
 0x27e   : > { %v2105_v62 = vpop.f32.mrf.mxu0 }
 0x27f   : > { %v1251_v26 = vadd.f32 %v1133_v49, %v969_v34  ;;  %v1148_v30 = vadd.f32 %v2105_v62, %v3118_v46  ;;  %2177 = vmatprep.mubr.f32.mxu1 %v1281_v22  ;;  %v1284_v44 = vmax.f32 %v1252_v50, 0.0  ;;  %v3367_v62 = vmax.f32 %v3020_v3, 0.0 }
 0x280   : > { %v1142_v4 = vpop.f32.mrf.mxu0  ;;  %2178 = vmatmul.mubr.f32.gmra.mxu1 %v1282_v47  ;;  %v3370_v3 = vmax.f32 %v3040_v57, 0.0 }
 0x281   : > { %v1283_v28 = vmax.f32 %v1251_v26, 0.0  ;;  %v1143_v39 = vadd.f32 %v3118_v46, %v1142_v4  ;;  %v1254_v11 = vadd.f32 %v1148_v30, %v972_v42 }
 0x282   : > { %v2108_v6 = vpop.f32.mrf.mxu0 }
 0x283   : > { %v1253_v10 = vadd.f32 %v1143_v39, %v971_v40  ;;  %v1158_v36 = vadd.f32 %v2108_v6, %v3118_v46  ;;  %2180 = vmatprep.mubr.f32.mxu1 %v1283_v28  ;;  %v1286_v56 = vmax.f32 %v1254_v11, 0.0  ;;  %v3369_v6 = vmax.f32 %v3036_v19, 0.0 }
 0x284   : > { %v1152_v45 = vpop.f32.mrf.mxu0  ;;  %2181 = vmatmul.mubr.f32.gmra.mxu1 %v1284_v44  ;;  %v3372_v19 = vmax.f32 %v3056_v58, 0.0 }
 0x285   : > { %v1285_v34 = vmax.f32 %v1253_v10, 0.0  ;;  %v1153_v13 = vadd.f32 %v3118_v46, %v1152_v45  ;;  %v1256_v15 = vadd.f32 %v1158_v36, %v974_v51 }
 0x286   : > { %v2111_v9 = vpop.f32.mrf.mxu0 }
 0x287   : > { %v1255_v17 = vadd.f32 %v1153_v13, %v973_v7  ;;  %v1168_v42 = vadd.f32 %v2111_v9, %v3118_v46  ;;  %2183 = vmatprep.mubr.f32.mxu1 %v1285_v34  ;;  %v1288_v21 = vmax.f32 %v1256_v15, 0.0  ;;  %v3371_v9 = vmax.f32 %v3052_v37, 0.0 }
 0x288   : > { %v1162_v27 = vpop.f32.mrf.mxu0  ;;  %2184 = vmatmul.mubr.f32.gmra.mxu1 %v1286_v56  ;;  %v3374_v37 = vmax.f32 %v3072_v0, 0.0 }
 0x289   : > { %v1287_v40 = vmax.f32 %v1255_v17, 0.0  ;;  %v1163_v38 = vadd.f32 %v3118_v46, %v1162_v27  ;;  %v1258_v41 = vadd.f32 %v1168_v42, %v976_v35 }
 0x28a   : > { %v2114_v29 = vpop.f32.mrf.mxu0 }
 0x28b   : > { %v1257_v61 = vadd.f32 %v1163_v38, %v975_v25  ;;  %v1178_v51 = vadd.f32 %v2114_v29, %v3118_v46  ;;  %2186 = vmatprep.mubr.f32.mxu1 %v1287_v40  ;;  %v1290_v12 = vmax.f32 %v1258_v41, 0.0  ;;  %v3373_v29 = vmax.f32 %v3068_v55, 0.0 }
 0x28c   : > { %v1172_v8 = vpop.f32.mrf.mxu0  ;;  %2187 = vmatmul.mubr.f32.gmra.mxu1 %v1288_v21 }
 0x28d   : > { %v1289_v7 = vmax.f32 %v1257_v61, 0.0  ;;  %v1173_v33 = vadd.f32 %v3118_v46, %v1172_v8  ;;  %v1260_v32 = vadd.f32 %v1178_v51, %v3363_v18 }
 0x28e   : > { %v2117_v16 = vpop.f32.mrf.mxu0 }
 0x28f   : > { %v1259_v35 = vadd.f32 %v1173_v33, %v3364_v48  ;;  %v1188_v43 = vadd.f32 %v2117_v16, %v3118_v46  ;;  %2189 = vmatprep.mubr.f32.mxu1 %v1289_v7  ;;  %v1292_v2 = vmax.f32 %v1260_v32, 0.0  ;;  %v3375_v32 = vmax.f32 %v3084_v23, 0.0 }
 0x290   : > { %v1182_v59 = vpop.f32.mrf.mxu0  ;;  %2190 = vmatmul.mubr.f32.gmra.mxu1 %v1290_v12  ;;  %v3376_v48 = vmax.f32 %v3088_v31, 0.0 }
 0x291   : > { %v1291_v25 = vmax.f32 %v1259_v35, 0.0  ;;  %v1183_v53 = vadd.f32 %v3118_v46, %v1182_v59  ;;  %v1262_v20 = vadd.f32 %v1188_v43, %v3365_v5  ;;  %v3219_v43 = vld [vmem:[%s3301_s6] ss:$0 sm:$0xff] }
 0x292   : > { %v2120_v24 = vpop.f32.mrf.mxu0 }
 0x293   : > { %v1261_v63 = vadd.f32 %v1183_v53, %v3366_v54  ;;  %v1198_v22 = vadd.f32 %v2120_v24, %v3118_v46  ;;  %2192 = vmatprep.mubr.f32.mxu1 %v1291_v25  ;;  %v1294_v50 = vmax.f32 %v1262_v20, 0.0 }
 0x294   : > { %v1192_v14 = vpop.f32.mrf.mxu0  ;;  %2193 = vmatmul.mubr.f32.gmra.mxu1 %v1292_v2 }
 0x295   : > { %v1293_v49 = vmax.f32 %v1261_v63, 0.0  ;;  %v1193_v47 = vadd.f32 %v3118_v46, %v1192_v14  ;;  %v1264_v26 = vadd.f32 %v1198_v22, %v3367_v62 }
 0x296   : > { %v2123_v30 = vpop.f32.mrf.mxu0 }
 0x297   : > { %v1263_v4 = vadd.f32 %v1193_v47, %v3368_v60  ;;  %v1208_v28 = vadd.f32 %v2123_v30, %v3118_v46  ;;  %2195 = vmatprep.mubr.f32.mxu1 %v1293_v49  ;;  %v1296_v11 = vmax.f32 %v1264_v26, 0.0 }
 0x298   : > { %v1202_v52 = vpop.f32.mrf.mxu0  ;;  %2196 = vmatmul.mubr.f32.gmra.mxu1 %v1294_v50 }
 0x299   : > { %v1295_v39 = vmax.f32 %v1263_v4, 0.0  ;;  %v1203_v44 = vadd.f32 %v3118_v46, %v1202_v52  ;;  %v1266_v10 = vadd.f32 %v1208_v28, %v3369_v6 }
 0x29a   : > { %v2126_v36 = vpop.f32.mrf.mxu0 }
 0x29b   : > { %v1265_v45 = vadd.f32 %v1203_v44, %v3370_v3  ;;  %v1218_v34 = vadd.f32 %v2126_v36, %v3118_v46  ;;  %2198 = vmatprep.mubr.f32.mxu1 %v1295_v39  ;;  %v1298_v15 = vmax.f32 %v1266_v10, 0.0 }
 0x29c   : > { %v1212_v1 = vpop.f32.mrf.mxu0  ;;  %2199 = vmatmul.mubr.f32.gmra.mxu1 %v1296_v11 }
 0x29d   : > { %v1297_v13 = vmax.f32 %v1265_v45, 0.0  ;;  %v1213_v56 = vadd.f32 %v3118_v46, %v1212_v1  ;;  %v1268_v17 = vadd.f32 %v1218_v34, %v3371_v9 }
 0x29e   : > { %v2129_v42 = vpop.f32.mrf.mxu0 }
 0x29f   : > { %v1267_v27 = vadd.f32 %v1213_v56, %v3372_v19  ;;  %v1228_v40 = vadd.f32 %v2129_v42, %v3118_v46  ;;  %2201 = vmatprep.mubr.f32.mxu1 %v1297_v13  ;;  %v1300_v41 = vmax.f32 %v1268_v17, 0.0 }
 0x2a0   : > { %v1222_v57 = vpop.f32.mrf.mxu0  ;;  %2202 = vmatmul.mubr.f32.gmra.mxu1 %v1298_v15 }
 0x2a1   : > { %v1299_v38 = vmax.f32 %v1267_v27, 0.0  ;;  %v1223_v21 = vadd.f32 %v3118_v46, %v1222_v57  ;;  %v1270_v61 = vadd.f32 %v1228_v40, %v3373_v29 }
 0x2a2   : > { %v2132_v51 = vpop.f32.mrf.mxu0 }
 0x2a3   : > { %v1269_v8 = vadd.f32 %v1223_v21, %v3374_v37  ;;  %v1238_v7 = vadd.f32 %v2132_v51, %v3118_v46  ;;  %2204 = vmatprep.mubr.f32.mxu1 %v1299_v38  ;;  %v1302_v18 = vmax.f32 %v1270_v61, 0.0 }
 0x2a4   : > { %v1232_v58 = vpop.f32.mrf.mxu0  ;;  %2205 = vmatmul.mubr.f32.gmra.mxu1 %v1300_v41 }
 0x2a5   : > { %v1301_v33 = vmax.f32 %v1269_v8, 0.0  ;;  %v1233_v12 = vadd.f32 %v3118_v46, %v1232_v58  ;;  %v1272_v16 = vadd.f32 %v1238_v7, %v3375_v32 }
 0x2a7   : > { %v1271_v55 = vadd.f32 %v1233_v12, %v3376_v48  ;;  %2207 = vmatprep.mubr.f32.mxu1 %v1301_v33  ;;  %v1304_v0 = vmax.f32 %v1272_v16, 0.0 }
 0x2a8   : > { %2208 = vmatmul.mubr.f32.gmra.mxu1 %v1302_v18 }
 0x2a9   : > { %v1303_v35 = vmax.f32 %v1271_v55, 0.0 }
 0x2ab   : > { %2210 = vmatprep.mubr.f32.mxu1 %v1303_v35 }
 0x2ac   : > { %2211 = vmatmul.mubr.f32.gmra.mxu1 %v1304_v0 }
 0x330   : > { %v2167_v59 = vpop.f32.mrf.mxu0 }
 0x331   : > { %v1400_v46 = vadd.f32 %v2167_v59, %v3219_v43 }
 0x332   : > { %v1394_v25 = vpop.f32.mrf.mxu0 }
 0x333   : > { %2253 = vtanh.f32 %v1400_v46  ;;  %v1395_v23 = vadd.f32 %v3219_v43, %v1394_v25 }
 0x334   : > { %v2170_v31 = vpop.f32.mrf.mxu0 }
 0x335   : > { %2255 = vtanh.f32 %v1395_v23  ;;  %v1410_v53 = vadd.f32 %v2170_v31, %v3219_v43 }
 0x336   : > { %v1404_v2 = vpop.f32.mrf.mxu0 }
 0x337   : > { %2257 = vtanh.f32 %v1410_v53  ;;  %v1405_v5 = vadd.f32 %v3219_v43, %v1404_v2 }
 0x338   : > { %v2173_v20 = vpop.f32.mrf.mxu0 }
 0x339   : > { %2259 = vtanh.f32 %v1405_v5  ;;  %v1420_v24 = vadd.f32 %v2173_v20, %v3219_v43 }
 0x33a   : > { %v1414_v54 = vpop.f32.mrf.mxu0 }
 0x33b   : > { %2261 = vtanh.f32 %v1420_v24  ;;  %v1415_v63 = vadd.f32 %v3219_v43, %v1414_v54 }
 0x33c   : > { %v2176_v22 = vpop.f32.mrf.mxu1 }
 0x33d   : > { %2263 = vtanh.f32 %v1415_v63  ;;  %v1430_v14 = vadd.f32 %v2176_v22, %v3219_v43 }
 0x33e   : > { %v1424_v49 = vpop.f32.mrf.mxu1 }
 0x33f   : > { %2265 = vtanh.f32 %v1430_v14  ;;  %v1425_v47 = vadd.f32 %v3219_v43, %v1424_v49 }
 0x340   : > { %v2254_v50 = vpop.eup %2253  ;;  %v2179_v62 = vpop.f32.mrf.mxu1 }
 0x341   : > { %1586 = vst [vmem:[%s3233_s23 + $0x8] sm:$0xff] %v2254_v50  ;;  %2267 = vtanh.f32 %v1425_v47  ;;  %v1440_v26 = vadd.f32 %v2179_v62, %v3219_v43 }
 0x342   : > { %v2256_v30 = vpop.eup %2255  ;;  %v1434_v60 = vpop.f32.mrf.mxu1 }
 0x343   : > { %1585 = vst [vmem:[%s3233_s23] sm:$0xff] %v2256_v30  ;;  %2269 = vtanh.f32 %v1440_v26  ;;  %v1435_v4 = vadd.f32 %v3219_v43, %v1434_v60 }
 0x344   : > { %v2258_v28 = vpop.eup %2257  ;;  %v2182_v52 = vpop.f32.mrf.mxu1 }
 0x345   : > { %1588 = vst [vmem:[%s3233_s23 + $0x18] sm:$0xff] %v2258_v28  ;;  %2271 = vtanh.f32 %v1435_v4  ;;  %v1450_v39 = vadd.f32 %v2182_v52, %v3219_v43 }
 0x346   : > { %v2260_v44 = vpop.eup %2259  ;;  %v1444_v11 = vpop.f32.mrf.mxu1 }
 0x347   : > { %1587 = vst [vmem:[%s3233_s23 + $0x10] sm:$0xff] %v2260_v44  ;;  %2273 = vtanh.f32 %v1450_v39  ;;  %v1445_v6 = vadd.f32 %v3219_v43, %v1444_v11 }
 0x348   : > { %v2262_v10 = vpop.eup %2261  ;;  %v2185_v36 = vpop.f32.mrf.mxu1 }
 0x349   : > { %1590 = vst [vmem:[%s3233_s23 + $0x28] sm:$0xff] %v2262_v10  ;;  %2275 = vtanh.f32 %v1445_v6  ;;  %v1460_v3 = vadd.f32 %v2185_v36, %v3219_v43 }
 0x34a   : > { %v2264_v45 = vpop.eup %2263  ;;  %v1454_v34 = vpop.f32.mrf.mxu1 }
 0x34b   : > { %1589 = vst [vmem:[%s3233_s23 + $0x20] sm:$0xff] %v2264_v45  ;;  %2277 = vtanh.f32 %v1460_v3  ;;  %v1455_v1 = vadd.f32 %v3219_v43, %v1454_v34 }
 0x34c   : > { %v2266_v13 = vpop.eup %2265  ;;  %v2188_v56 = vpop.f32.mrf.mxu1 }
 0x34d   : > { %1592 = vst [vmem:[%s3233_s23 + $0x38] sm:$0xff] %v2266_v13  ;;  %2279 = vtanh.f32 %v1455_v1  ;;  %v1470_v15 = vadd.f32 %v2188_v56, %v3219_v43 }
 0x34e   : > { %v2268_v9 = vpop.eup %2267  ;;  %v1464_v17 = vpop.f32.mrf.mxu1 }
 0x34f   : > { %1591 = vst [vmem:[%s3233_s23 + $0x30] sm:$0xff] %v2268_v9  ;;  %2281 = vtanh.f32 %v1470_v15  ;;  %v1465_v42 = vadd.f32 %v3219_v43, %v1464_v17 }
 0x350   : > { %v2270_v19 = vpop.eup %2269  ;;  %v2191_v27 = vpop.f32.mrf.mxu1 }
 0x351   : > { %1594 = vst [vmem:[%s3233_s23 + $0x48] sm:$0xff] %v2270_v19  ;;  %2283 = vtanh.f32 %v1465_v42  ;;  %v1480_v40 = vadd.f32 %v2191_v27, %v3219_v43 }
 0x352   : > { %v2272_v57 = vpop.eup %2271  ;;  %v1474_v38 = vpop.f32.mrf.mxu1 }
 0x353   : > { %1593 = vst [vmem:[%s3233_s23 + $0x40] sm:$0xff] %v2272_v57  ;;  %2285 = vtanh.f32 %v1480_v40  ;;  %v1475_v21 = vadd.f32 %v3219_v43, %v1474_v38 }
 0x354   : > { %v2274_v41 = vpop.eup %2273  ;;  %v2194_v29 = vpop.f32.mrf.mxu1 }
 0x355   : > { %1596 = vst [vmem:[%s3233_s23 + $0x58] sm:$0xff] %v2274_v41  ;;  %2287 = vtanh.f32 %v1475_v21  ;;  %v1490_v61 = vadd.f32 %v2194_v29, %v3219_v43 }
 0x356   : > { %v2276_v51 = vpop.eup %2275  ;;  %v1484_v37 = vpop.f32.mrf.mxu1 }
 0x357   : > { %1595 = vst [vmem:[%s3233_s23 + $0x50] sm:$0xff] %v2276_v51  ;;  %2289 = vtanh.f32 %v1490_v61  ;;  %v1485_v8 = vadd.f32 %v3219_v43, %v1484_v37 }
 0x358   : > { %v2278_v7 = vpop.eup %2277  ;;  %v2197_v58 = vpop.f32.mrf.mxu1 }
 0x359   : > { %1598 = vst [vmem:[%s3233_s23 + $0x68] sm:$0xff] %v2278_v7  ;;  %2291 = vtanh.f32 %v1485_v8  ;;  %v1500_v33 = vadd.f32 %v2197_v58, %v3219_v43 }
 0x35a   : > { %v2280_v12 = vpop.eup %2279  ;;  %v1494_v18 = vpop.f32.mrf.mxu1 }
 0x35b   : > { %1597 = vst [vmem:[%s3233_s23 + $0x60] sm:$0xff] %v2280_v12  ;;  %2293 = vtanh.f32 %v1500_v33  ;;  %v1495_v32 = vadd.f32 %v3219_v43, %v1494_v18 }
 0x35c   : > { %v2282_v16 = vpop.eup %2281  ;;  %v2200_v48 = vpop.f32.mrf.mxu1 }
 0x35d   : > { %1600 = vst [vmem:[%s3233_s23 + $0x78] sm:$0xff] %v2282_v16  ;;  %2295 = vtanh.f32 %v1495_v32  ;;  %v1510_v55 = vadd.f32 %v2200_v48, %v3219_v43 }
 0x35e   : > { %v2284_v35 = vpop.eup %2283  ;;  %v1504_v0 = vpop.f32.mrf.mxu1 }
 0x35f   : > { %1599 = vst [vmem:[%s3233_s23 + $0x70] sm:$0xff] %v2284_v35  ;;  %2297 = vtanh.f32 %v1510_v55  ;;  %v1505_v59 = vadd.f32 %v3219_v43, %v1504_v0 }
 0x360   : > { %v2286_v46 = vpop.eup %2285  ;;  %v2203_v25 = vpop.f32.mrf.mxu1 }
 0x361   : > { %1602 = vst [vmem:[%s3233_s23 + $0x88] sm:$0xff] %v2286_v46  ;;  %2299 = vtanh.f32 %v1505_v59  ;;  %v1520_v23 = vadd.f32 %v2203_v25, %v3219_v43 }
 0x362   : > { %v2288_v31 = vpop.eup %2287  ;;  %v1514_v53 = vpop.f32.mrf.mxu1 }
 0x363   : > { %1601 = vst [vmem:[%s3233_s23 + $0x80] sm:$0xff] %v2288_v31  ;;  %2301 = vtanh.f32 %v1520_v23  ;;  %v1515_v2 = vadd.f32 %v3219_v43, %v1514_v53 }
 0x364   : > { %v2290_v5 = vpop.eup %2289  ;;  %v2206_v20 = vpop.f32.mrf.mxu1 }
 0x365   : > { %1604 = vst [vmem:[%s3233_s23 + $0x98] sm:$0xff] %v2290_v5  ;;  %2303 = vtanh.f32 %v1515_v2  ;;  %v1530_v24 = vadd.f32 %v2206_v20, %v3219_v43 }
 0x366   : > { %v2292_v54 = vpop.eup %2291  ;;  %v1524_v63 = vpop.f32.mrf.mxu1 }
 0x367   : > { %1603 = vst [vmem:[%s3233_s23 + $0x90] sm:$0xff] %v2292_v54  ;;  %2305 = vtanh.f32 %v1530_v24  ;;  %v1525_v22 = vadd.f32 %v3219_v43, %v1524_v63 }
 0x368   : > { %v2294_v14 = vpop.eup %2293  ;;  %v2209_v49 = vpop.f32.mrf.mxu1 }
 0x369   : > { %1606 = vst [vmem:[%s3233_s23 + $0xa8] sm:$0xff] %v2294_v14  ;;  %2307 = vtanh.f32 %v1525_v22  ;;  %v1540_v47 = vadd.f32 %v2209_v49, %v3219_v43 }
 0x36a   : > { %v2296_v50 = vpop.eup %2295  ;;  %v1534_v62 = vpop.f32.mrf.mxu1 }
 0x36b   : > { %1605 = vst [vmem:[%s3233_s23 + $0xa0] sm:$0xff] %v2296_v50  ;;  %2309 = vtanh.f32 %v1540_v47  ;;  %v1535_v26 = vadd.f32 %v3219_v43, %v1534_v62 }
 0x36c   : > { %v2298_v30 = vpop.eup %2297  ;;  %v2212_v60 = vpop.f32.mrf.mxu1 }
 0x36d   : > { %1608 = vst [vmem:[%s3233_s23 + $0xb8] sm:$0xff] %v2298_v30  ;;  %2311 = vtanh.f32 %v1535_v26  ;;  %v1550_v4 = vadd.f32 %v2212_v60, %v3219_v43 }
 0x36e   : > { %v2300_v28 = vpop.eup %2299  ;;  %v1544_v52 = vpop.f32.mrf.mxu1 }
 0x36f   : > { %1607 = vst [vmem:[%s3233_s23 + $0xb0] sm:$0xff] %v2300_v28  ;;  %2313 = vtanh.f32 %v1550_v4  ;;  %v1545_v39 = vadd.f32 %v3219_v43, %v1544_v52 }
 0x370   : > { %v2302_v44 = vpop.eup %2301 }
 0x371   : > { %1610 = vst [vmem:[%s3233_s23 + $0xc8] sm:$0xff] %v2302_v44  ;;  %2315 = vtanh.f32 %v1545_v39 }
 0x372   : > { %v2304_v11 = vpop.eup %2303 }
 0x373   : > { %1609 = vst [vmem:[%s3233_s23 + $0xc0] sm:$0xff] %v2304_v11 }
 0x374   : > { %v2306_v6 = vpop.eup %2305 }
 0x375   : > { %1612 = vst [vmem:[%s3233_s23 + $0xd8] sm:$0xff] %v2306_v6 }
 0x376   : > { %v2308_v10 = vpop.eup %2307 }
 0x377   : > { %1611 = vst [vmem:[%s3233_s23 + $0xd0] sm:$0xff] %v2308_v10 }
 0x378   : > { %v2310_v36 = vpop.eup %2309 }
 0x379   : > { %1614 = vst [vmem:[%s3233_s23 + $0xe8] sm:$0xff] %v2310_v36 }
 0x37a   : > { %v2312_v3 = vpop.eup %2311 }
 0x37b   : > { %1613 = vst [vmem:[%s3233_s23 + $0xe0] sm:$0xff] %v2312_v3 }
 0x37c   : > { %v2314_v45 = vpop.eup %2313 }
 0x37d   : > { %1616 = vst [vmem:[%s3233_s23 + $0xf8] sm:$0xff] %v2314_v45 }
 0x37e   : > { %v2316_v34 = vpop.eup %2315 }
 0x37f   : > { %1615 = vst [vmem:[%s3233_s23 + $0xf0] sm:$0xff] %v2316_v34 }
 0x380 PF: > { %s17_s24 = sadd.s32 1, %s2323_s24  }
 0x381   : > { %p14_p4 = scmp.ge.s32.totalorder %s17_s24, 4  }
 0x383   :  { %16 = sbr.rel (!%p14_p4) target bundleno = 1 (0x1), region = 80 }

</bundles_post_ra>
